<compile_context>
chip_gen: v7x
topology: tpu7x:2x2x1
jax: 0.10.0
libtpu: 0.0.40
codegen_flags: <defaults>
</compile_context>

<pallas_src>
import functools

import jax
import jax.numpy as jnp
from jax import lax
from jax.experimental import pallas as pl
from jax.experimental.pallas import tpu as pltpu


# ----------------------------- in-kernel math helpers -----------------------------

def _layernorm(x, gamma, beta, eps=1e-5):
    mu = jnp.mean(x, axis=-1, keepdims=True)
    var = jnp.mean((x - mu) ** 2, axis=-1, keepdims=True)
    return (x - mu) * lax.rsqrt(var + eps) * gamma + beta


def _softmax(s):
    m = jnp.max(s, axis=-1, keepdims=True)
    e = jnp.exp(s - m)
    # divide -> EUP reciprocal + VPU multiply (EUP slot is otherwise idle here)
    return e * pl.reciprocal(jnp.sum(e, axis=-1, keepdims=True), approx=True)


def _erf(x):
    # Abramowitz & Stegun 7.1.26 (max abs error 1.5e-7); only exp/mul/add/select, so it
    # lowers in Mosaic independent of erf_p support. Preserves NaN (select false-branch).
    p = 0.3275911
    a1, a2, a3, a4, a5 = 0.254829592, -0.284496736, 1.421413741, -1.453152027, 1.061405429
    ax = jnp.abs(x)
    t = 1.0 / (1.0 + p * ax)
    poly = ((((a5 * t + a4) * t + a3) * t + a2) * t + a1) * t
    y = 1.0 - poly * jnp.exp(-ax * ax)
    return jnp.where(x < 0, -y, y)


def _gelu_exact(x):
    # nn.GELU() default = exact erf formulation
    return 0.5 * x * (1.0 + _erf(x * 0.7071067811865476))


def _matmul_bf16(a_f32, w_bf16, b_f32):
    """y = a @ w + b with bf16 MXU operands and f32 accumulation."""
    y = lax.dot_general(a_f32.astype(jnp.bfloat16), w_bf16,
                        (((1,), (0,)), ((), ())),
                        preferred_element_type=jnp.float32)
    return y + b_f32


def _attend(q, k, v, *, num_heads, head_dim, n_batch, seq_q, seq_kv, masked):
    """q: (n_batch*seq_q, E) f32;  k, v: (n_batch*seq_kv, E) f32  ->  (n_batch*seq_q, E) f32."""
    q16 = q.astype(jnp.bfloat16)
    k16 = k.astype(jnp.bfloat16)
    v16 = v.astype(jnp.bfloat16)
    if masked:
        row = lax.broadcasted_iota(jnp.int32, (seq_q, seq_kv), 0)
        col = lax.broadcasted_iota(jnp.int32, (seq_q, seq_kv), 1)
        lower = col <= row  # exactly torch.tril(ones).bool()
    blocks = []
    for b in range(n_batch):                      # static unrolled, n_batch is tiny
        qb = q16[b * seq_q:(b + 1) * seq_q]
        kb = k16[b * seq_kv:(b + 1) * seq_kv]
        vb = v16[b * seq_kv:(b + 1) * seq_kv]
        heads = []
        # Per-head contractions stay a static H-loop: Mosaic's in-kernel support for
        # non-leading batch-dim dot_general / 3D (1,0,2) transposes is unreliable, and at
        # these sizes the batched-head relayout would cost more than it saves.
        for h in range(num_heads):
            sl = slice(h * head_dim, (h + 1) * head_dim)
            # q_h @ k_h^T without materializing the transpose (NT matmul on the MXU)
            s = lax.dot_general(qb[:, sl], kb[:, sl],
                                (((1,), (1,)), ((), ())),
                                preferred_element_type=jnp.float32)
            if masked:
                # reproduces masked_fill(tril, -inf) from the reference (NaN row included)
                s = jnp.where(lower, -jnp.inf, s)
            p = _softmax(s)
            heads.append(lax.dot_general(p.astype(jnp.bfloat16), vb[:, sl],
                                         (((1,), (0,)), ((), ())),
                                         preferred_element_type=jnp.float32))
        blocks.append(jnp.concatenate(heads, axis=-1))
    return blocks[0] if n_batch == 1 else jnp.concatenate(blocks, axis=0)


# --------------------------------- Pallas kernel ----------------------------------

def decoder_layer_kernel(
    x_ref, enc_ref,
    ln1_g, ln1_b, ln2_g, ln2_b, ln3_g, ln3_b,
    m_wqkv, m_bqkv, m_wo, m_bo,
    c_wq, c_bq, c_wkv, c_bkv, c_wo, c_bo,
    ff_wu, ff_bu, ff_wd, ff_bd,
    out_ref,
    *, num_heads, head_dim, batch_block, seq_q, seq_kv):
    E = num_heads * head_dim
    x = x_ref[...].reshape(batch_block * seq_q, E)        # residual stream, f32
    enc = enc_ref[...].reshape(batch_block * seq_kv, E)

    # ---- masked multi-head self-attention block (pre-LN residual) ----
    h = _layernorm(x, ln1_g[...], ln1_b[...])
    qkv = _matmul_bf16(h, m_wqkv[...], m_bqkv[...])       # fused Q|K|V : (R, 3E)
    attn = _attend(qkv[:, :E], qkv[:, E:2 * E], qkv[:, 2 * E:],
                   num_heads=num_heads, head_dim=head_dim,
                   n_batch=batch_block, seq_q=seq_q, seq_kv=seq_q, masked=True)
    x = x + _matmul_bf16(attn, m_wo[...], m_bo[...])

    # ---- cross multi-head attention block ----
    h = _layernorm(x, ln2_g[...], ln2_b[...])
    q = _matmul_bf16(h, c_wq[...], c_bq[...])             # (R, E)
    kv = _matmul_bf16(enc, c_wkv[...], c_bkv[...])        # fused K|V : (Bb*S_enc, 2E)
    attn = _attend(q, kv[:, :E], kv[:, E:],
                   num_heads=num_heads, head_dim=head_dim,
                   n_batch=batch_block, seq_q=seq_q, seq_kv=seq_kv, masked=False)
    x = x + _matmul_bf16(attn, c_wo[...], c_bo[...])

    # ---- feed-forward block ----
    h = _layernorm(x, ln3_g[...], ln3_b[...])
    up = _matmul_bf16(h, ff_wu[...], ff_bu[...])
    up = _gelu_exact(up)                                  # nn.GELU() default = exact erf
    x = x + _matmul_bf16(up, ff_wd[...], ff_bd[...])      # dropout = identity (eval)

    out_ref[...] = x.reshape(batch_block, seq_q, E).astype(out_ref.dtype)


# ----------------------------------- wrapper ---------------------------------------

PACKED_ORDER = [
    "ln1_g", "ln1_b", "ln2_g", "ln2_b", "ln3_g", "ln3_b",
    "m_wqkv", "m_bqkv", "m_wo", "m_bo",
    "c_wq", "c_bq", "c_wkv", "c_bkv", "c_wo", "c_bo",
    "ff_wu", "ff_bu", "ff_wd", "ff_bd",
]


def _pick_batch_block(batch):
    # Fold as much batch as possible per program while keeping >= 2 programs so both
    # v7x TensorCores stay busy (no-op on single-TC v5e/v6e).
    for bb in range(batch // 2, 0, -1):
        if batch % bb == 0:
            return bb
    return 1


def _pack_params(params):
    bf16, f32 = jnp.bfloat16, jnp.float32
    cat = lambda *ks: jnp.concatenate([params[k] for k in ks], axis=-1)
    return {
        "ln1_g": params["ln1_g"].astype(f32), "ln1_b": params["ln1_b"].astype(f32),
        "ln2_g": params["ln2_g"].astype(f32), "ln2_b": params["ln2_b"].astype(f32),
        "ln3_g": params["ln3_g"].astype(f32), "ln3_b": params["ln3_b"].astype(f32),
        "m_wqkv": cat("m_wq", "m_wk", "m_wv").astype(bf16),
        "m_bqkv": cat("m_bq", "m_bk", "m_bv").astype(f32),
        "m_wo": params["m_wo"].astype(bf16), "m_bo": params["m_bo"].astype(f32),
        "c_wq": params["c_wq"].astype(bf16), "c_bq": params["c_bq"].astype(f32),
        "c_wkv": cat("c_wk", "c_wv").astype(bf16),
        "c_bkv": cat("c_bk", "c_bv").astype(f32),
        "c_wo": params["c_wo"].astype(bf16), "c_bo": params["c_bo"].astype(f32),
        "ff_wu": params["ff_wu"].astype(bf16), "ff_bu": params["ff_bu"].astype(f32),
        "ff_wd": params["ff_wd"].astype(bf16), "ff_bd": params["ff_bd"].astype(f32),
    }


def decoder_layer(x, enc, params, num_heads, batch_block=None):
    B, S, E = x.shape
    _, S_enc, _ = enc.shape
    head_dim = E // num_heads
    if batch_block is None:
        batch_block = _pick_batch_block(B)
    assert B % batch_block == 0
    grid = (B // batch_block,)

    packed = _pack_params(params)
    weights = [packed[k] for k in PACKED_ORDER]

    in_specs = [
        pl.BlockSpec((batch_block, S, E), lambda b: (b, 0, 0)),
        pl.BlockSpec((batch_block, S_enc, E), lambda b: (b, 0, 0)),
    ] + [pl.BlockSpec(w.shape, lambda b: (0, 0)) for w in weights]   # all weights are 2D

    kernel = functools.partial(
        decoder_layer_kernel, num_heads=num_heads, head_dim=head_dim,
        batch_block=batch_block, seq_q=S, seq_kv=S_enc)

    return pl.pallas_call(
        kernel,
        out_shape=jax.ShapeDtypeStruct((B, S, E), x.dtype),
        grid=grid,
        in_specs=in_specs,
        out_specs=pl.BlockSpec((batch_block, S, E), lambda b: (b, 0, 0)),
        compiler_params=pltpu.CompilerParams(
            dimension_semantics=("parallel",),
            vmem_limit_bytes=32 * 1024 * 1024,
        ),
    )(x, enc, *weights)


# -------------------------- pure-JAX f32 reference (for check) ----------------------

def decoder_layer_ref(x, enc, p, num_heads):
    E = x.shape[-1]
    d = E // num_heads

    def ln(v, g, b, eps=1e-5):
        mu = v.mean(-1, keepdims=True)
        var = ((v - mu) ** 2).mean(-1, keepdims=True)
        return (v - mu) / jnp.sqrt(var + eps) * g + b

    def softmax(s):
        m = jnp.max(s, -1, keepdims=True)
        e = jnp.exp(s - m)
        return e / jnp.sum(e, -1, keepdims=True)

    def mha(hq, hkv, wq, bq, wk, bk, wv, bv, wo, bo, masked):
        q = hq @ wq + bq
        k = hkv @ wk + bk
        v = hkv @ wv + bv
        Sq, Sk = hq.shape[0], hkv.shape[0]
        if masked:
            tril = jnp.tril(jnp.ones((Sq, Sk), bool))
        outs = []
        for hh in range(num_heads):
            sl = slice(hh * d, (hh + 1) * d)
            s = q[:, sl] @ k[:, sl].T
            if masked:
                s = jnp.where(tril, -jnp.inf, s)
            outs.append(softmax(s) @ v[:, sl])
        return jnp.concatenate(outs, -1) @ wo + bo

    def one(xb, eb):
        h = ln(xb, p["ln1_g"], p["ln1_b"])
        xb = xb + mha(h, h, p["m_wq"], p["m_bq"], p["m_wk"], p["m_bk"],
                      p["m_wv"], p["m_bv"], p["m_wo"], p["m_bo"], True)
        h = ln(xb, p["ln2_g"], p["ln2_b"])
        xb = xb + mha(h, eb, p["c_wq"], p["c_bq"], p["c_wk"], p["c_bk"],
                      p["c_wv"], p["c_bv"], p["c_wo"], p["c_bo"], False)
        h = ln(xb, p["ln3_g"], p["ln3_b"])
        up = jax.nn.gelu(h @ p["ff_wu"] + p["ff_bu"], approximate=False)
        return xb + up @ p["ff_wd"] + p["ff_bd"]

    return jax.vmap(one)(x, enc)


# ------------------------------------- main ------------------------------------------

if __name__ == "__main__":
    B, S, S_ENC = 2, 8, 8
    E, H, I = 32, 4, 64          # hidden_size, num_attention_heads, intermediate_size
    key = jax.random.PRNGKey(0)
    ks = iter(jax.random.split(key, 40))

    def rnd(shape):
        return (0.02 * jax.random.normal(next(ks), shape)).astype(jnp.float32)

    params = {
        # LayerNorm params (torch default: gamma=1, beta=0), stored as (1, E)
        "ln1_g": jnp.ones((1, E), jnp.float32), "ln1_b": jnp.zeros((1, E), jnp.float32),
        "ln2_g": jnp.ones((1, E), jnp.float32), "ln2_b": jnp.zeros((1, E), jnp.float32),
        "ln3_g": jnp.ones((1, E), jnp.float32), "ln3_b": jnp.zeros((1, E), jnp.float32),
        # masked self-attention: per-head (E -> E/H) projections stacked into (E, E)
        "m_wq": rnd((E, E)), "m_bq": rnd((1, E)),
        "m_wk": rnd((E, E)), "m_bk": rnd((1, E)),
        "m_wv": rnd((E, E)), "m_bv": rnd((1, E)),
        "m_wo": rnd((E, E)), "m_bo": rnd((1, E)),
        # cross attention
        "c_wq": rnd((E, E)), "c_bq": rnd((1, E)),
        "c_wk": rnd((E, E)), "c_bk": rnd((1, E)),
        "c_wv": rnd((E, E)), "c_bv": rnd((1, E)),
        "c_wo": rnd((E, E)), "c_bo": rnd((1, E)),
        # feed forward
        "ff_wu": rnd((E, I)), "ff_bu": rnd((1, I)),
        "ff_wd": rnd((I, E)), "ff_bd": rnd((1, E)),
    }

    x = jax.random.normal(jax.random.PRNGKey(1), (B, S, E), jnp.float32)
    enc = jax.random.normal(jax.random.PRNGKey(2), (B, S_ENC, E), jnp.float32)

    out = decoder_layer(x, enc, params, num_heads=H)
    out = jax.block_until_ready(out)

    ref = decoder_layer_ref(x, enc, params, num_heads=H)
    assert out.shape == (B, S, E)
    # Last query row of the masked-attention softmax is all -inf -> NaN, exactly as in the
    # PyTorch reference; compare with equal_nan. Tolerance loosened for bf16 MXU operands.
    assert bool(jnp.allclose(out, ref, rtol=2e-2, atol=2e-2, equal_nan=True)), (
        float(jnp.nanmax(jnp.abs(out - ref))))

    print("KERNEL_OK")
</pallas_src>

<mosaic_0001>
module attributes {stable_mosaic.version = 11 : i64} {
  func.func @decoder_layer_kernel(%arg0: i32, %arg1: memref<1x8x32xf32, #tpu.memory_space<vmem>>, %arg2: memref<1x8x32xf32, #tpu.memory_space<vmem>>, %arg3: memref<1x32xf32, #tpu.memory_space<vmem>>, %arg4: memref<1x32xf32, #tpu.memory_space<vmem>>, %arg5: memref<1x32xf32, #tpu.memory_space<vmem>>, %arg6: memref<1x32xf32, #tpu.memory_space<vmem>>, %arg7: memref<1x32xf32, #tpu.memory_space<vmem>>, %arg8: memref<1x32xf32, #tpu.memory_space<vmem>>, %arg9: memref<32x96xbf16, #tpu.memory_space<vmem>>, %arg10: memref<1x96xf32, #tpu.memory_space<vmem>>, %arg11: memref<32x32xbf16, #tpu.memory_space<vmem>>, %arg12: memref<1x32xf32, #tpu.memory_space<vmem>>, %arg13: memref<32x32xbf16, #tpu.memory_space<vmem>>, %arg14: memref<1x32xf32, #tpu.memory_space<vmem>>, %arg15: memref<32x64xbf16, #tpu.memory_space<vmem>>, %arg16: memref<1x64xf32, #tpu.memory_space<vmem>>, %arg17: memref<32x32xbf16, #tpu.memory_space<vmem>>, %arg18: memref<1x32xf32, #tpu.memory_space<vmem>>, %arg19: memref<32x64xbf16, #tpu.memory_space<vmem>>, %arg20: memref<1x64xf32, #tpu.memory_space<vmem>>, %arg21: memref<64x32xbf16, #tpu.memory_space<vmem>>, %arg22: memref<1x32xf32, #tpu.memory_space<vmem>>, %arg23: memref<1x8x32xf32, #tpu.memory_space<vmem>>) attributes {dimension_semantics = [#tpu.dimension_semantics<parallel>], iteration_bounds = array<i64: 2>, scalar_prefetch = 0 : i64, scratch_operands = 0 : i64, tpu.core_type = #tpu.core_type<tc>, window_params = [{transform_indices = @transform_0, window_bounds = array<i64: 1, 8, 32>}, {transform_indices = @transform_1, window_bounds = array<i64: 1, 8, 32>}, {pipeline_mode = #tpu.pipeline_mode<synchronous>, transform_indices = @transform_2, window_bounds = array<i64: 1, 32>}, {pipeline_mode = #tpu.pipeline_mode<synchronous>, transform_indices = @transform_3, window_bounds = array<i64: 1, 32>}, {pipeline_mode = #tpu.pipeline_mode<synchronous>, transform_indices = @transform_4, window_bounds = array<i64: 1, 32>}, {pipeline_mode = #tpu.pipeline_mode<synchronous>, transform_indices = @transform_5, window_bounds = array<i64: 1, 32>}, {pipeline_mode = #tpu.pipeline_mode<synchronous>, transform_indices = @transform_6, window_bounds = array<i64: 1, 32>}, {pipeline_mode = #tpu.pipeline_mode<synchronous>, transform_indices = @transform_7, window_bounds = array<i64: 1, 32>}, {pipeline_mode = #tpu.pipeline_mode<synchronous>, transform_indices = @transform_8, window_bounds = array<i64: 32, 96>}, {pipeline_mode = #tpu.pipeline_mode<synchronous>, transform_indices = @transform_9, window_bounds = array<i64: 1, 96>}, {pipeline_mode = #tpu.pipeline_mode<synchronous>, transform_indices = @transform_10, window_bounds = array<i64: 32, 32>}, {pipeline_mode = #tpu.pipeline_mode<synchronous>, transform_indices = @transform_11, window_bounds = array<i64: 1, 32>}, {pipeline_mode = #tpu.pipeline_mode<synchronous>, transform_indices = @transform_12, window_bounds = array<i64: 32, 32>}, {pipeline_mode = #tpu.pipeline_mode<synchronous>, transform_indices = @transform_13, window_bounds = array<i64: 1, 32>}, {pipeline_mode = #tpu.pipeline_mode<synchronous>, transform_indices = @transform_14, window_bounds = array<i64: 32, 64>}, {pipeline_mode = #tpu.pipeline_mode<synchronous>, transform_indices = @transform_15, window_bounds = array<i64: 1, 64>}, {pipeline_mode = #tpu.pipeline_mode<synchronous>, transform_indices = @transform_16, window_bounds = array<i64: 32, 32>}, {pipeline_mode = #tpu.pipeline_mode<synchronous>, transform_indices = @transform_17, window_bounds = array<i64: 1, 32>}, {pipeline_mode = #tpu.pipeline_mode<synchronous>, transform_indices = @transform_18, window_bounds = array<i64: 32, 64>}, {pipeline_mode = #tpu.pipeline_mode<synchronous>, transform_indices = @transform_19, window_bounds = array<i64: 1, 64>}, {pipeline_mode = #tpu.pipeline_mode<synchronous>, transform_indices = @transform_20, window_bounds = array<i64: 64, 32>}, {pipeline_mode = #tpu.pipeline_mode<synchronous>, transform_indices = @transform_21, window_bounds = array<i64: 1, 32>}, {transform_indices = @transform_22, window_bounds = array<i64: 1, 8, 32>}]} {
    %c0 = arith.constant 0 : index
    %c0_0 = arith.constant 0 : index
    %c0_1 = arith.constant 0 : index
    %0 = vector.load %arg1[%c0, %c0_0, %c0_1] : memref<1x8x32xf32, #tpu.memory_space<vmem>>, vector<1x8x32xf32>
    %1 = vector.shape_cast %0 : vector<1x8x32xf32> to vector<8x32xf32>
    %c0_2 = arith.constant 0 : index
    %c0_3 = arith.constant 0 : index
    %c0_4 = arith.constant 0 : index
    %2 = vector.load %arg2[%c0_2, %c0_3, %c0_4] : memref<1x8x32xf32, #tpu.memory_space<vmem>>, vector<1x8x32xf32>
    %3 = vector.shape_cast %2 : vector<1x8x32xf32> to vector<8x32xf32>
    %c0_5 = arith.constant 0 : index
    %c0_6 = arith.constant 0 : index
    %4 = vector.load %arg3[%c0_5, %c0_6] : memref<1x32xf32, #tpu.memory_space<vmem>>, vector<1x32xf32>
    %c0_7 = arith.constant 0 : index
    %c0_8 = arith.constant 0 : index
    %5 = vector.load %arg4[%c0_7, %c0_8] : memref<1x32xf32, #tpu.memory_space<vmem>>, vector<1x32xf32>
    %cst = arith.constant dense<0.000000e+00> : vector<8xf32>
    %6 = vector.multi_reduction <add>, %1, %cst [1] : vector<8x32xf32> to vector<8xf32>
    %7 = vector.shape_cast %6 : vector<8xf32> to vector<8x1xf32>
    %cst_9 = arith.constant 3.200000e+01 : f32
    %8 = vector.broadcast %cst_9 : f32 to vector<8x1xf32>
    %9 = arith.divf %7, %8 : vector<8x1xf32>
    %10 = vector.broadcast %9 : vector<8x1xf32> to vector<8x32xf32>
    %11 = arith.subf %1, %10 : vector<8x32xf32>
    %12 = arith.mulf %11, %11 : vector<8x32xf32>
    %cst_10 = arith.constant dense<0.000000e+00> : vector<8xf32>
    %13 = vector.multi_reduction <add>, %12, %cst_10 [1] : vector<8x32xf32> to vector<8xf32>
    %14 = vector.shape_cast %13 : vector<8xf32> to vector<8x1xf32>
    %cst_11 = arith.constant 3.200000e+01 : f32
    %15 = vector.broadcast %cst_11 : f32 to vector<8x1xf32>
    %16 = arith.divf %14, %15 : vector<8x1xf32>
    %17 = vector.broadcast %9 : vector<8x1xf32> to vector<8x32xf32>
    %18 = arith.subf %1, %17 : vector<8x32xf32>
    %cst_12 = arith.constant 9.99999974E-6 : f32
    %19 = vector.broadcast %cst_12 : f32 to vector<8x1xf32>
    %20 = arith.addf %16, %19 : vector<8x1xf32>
    %21 = math.rsqrt %20 : vector<8x1xf32>
    %22 = vector.broadcast %21 : vector<8x1xf32> to vector<8x32xf32>
    %23 = arith.mulf %18, %22 : vector<8x32xf32>
    %24 = vector.broadcast %4 : vector<1x32xf32> to vector<8x32xf32>
    %25 = arith.mulf %23, %24 : vector<8x32xf32>
    %26 = vector.broadcast %5 : vector<1x32xf32> to vector<8x32xf32>
    %27 = arith.addf %25, %26 : vector<8x32xf32>
    %c0_13 = arith.constant 0 : index
    %c0_14 = arith.constant 0 : index
    %28 = vector.load %arg9[%c0_13, %c0_14] : memref<32x96xbf16, #tpu.memory_space<vmem>>, vector<32x96xbf16>
    %c0_15 = arith.constant 0 : index
    %c0_16 = arith.constant 0 : index
    %29 = vector.load %arg10[%c0_15, %c0_16] : memref<1x96xf32, #tpu.memory_space<vmem>>, vector<1x96xf32>
    %30 = arith.truncf %27 : vector<8x32xf32> to vector<8x32xbf16>
    %cst_17 = arith.constant dense<0.000000e+00> : vector<8x96xf32>
    %31 = tpu.matmul %30, %28, %cst_17 {dimension_numbers = #tpu.dot_dimension_numbers<[1], [0], [0], [1], [0, 0, 1, 1], [], []>} : vector<8x32xbf16>, vector<32x96xbf16>, vector<8x96xf32> -> vector<8x96xf32>
    %32 = vector.broadcast %29 : vector<1x96xf32> to vector<8x96xf32>
    %33 = arith.addf %31, %32 : vector<8x96xf32>
    %34 = vector.extract_strided_slice %33 {offsets = [0, 0], sizes = [8, 32], strides = [1, 1]} : vector<8x96xf32> to vector<8x32xf32>
    %35 = vector.extract_strided_slice %33 {offsets = [0, 32], sizes = [8, 32], strides = [1, 1]} : vector<8x96xf32> to vector<8x32xf32>
    %36 = vector.extract_strided_slice %33 {offsets = [0, 64], sizes = [8, 32], strides = [1, 1]} : vector<8x96xf32> to vector<8x32xf32>
    %37 = arith.truncf %34 : vector<8x32xf32> to vector<8x32xbf16>
    %38 = arith.truncf %35 : vector<8x32xf32> to vector<8x32xbf16>
    %39 = arith.truncf %36 : vector<8x32xf32> to vector<8x32xbf16>
    %40 = tpu.iota {dimensions = array<i32: 0>} : vector<8x8xi32>
    %41 = tpu.iota {dimensions = array<i32: 1>} : vector<8x8xi32>
    %42 = arith.cmpi sle, %41, %40 : vector<8x8xi32>
    %43 = vector.extract_strided_slice %37 {offsets = [0, 0], sizes = [8, 8], strides = [1, 1]} : vector<8x32xbf16> to vector<8x8xbf16>
    %44 = vector.extract_strided_slice %38 {offsets = [0, 0], sizes = [8, 8], strides = [1, 1]} : vector<8x32xbf16> to vector<8x8xbf16>
    %cst_18 = arith.constant dense<0.000000e+00> : vector<8x8xf32>
    %45 = tpu.matmul %43, %44, %cst_18 {dimension_numbers = #tpu.dot_dimension_numbers<[1], [1], [0], [0], [0, 0, 1, 0], [], []>} : vector<8x8xbf16>, vector<8x8xbf16>, vector<8x8xf32> -> vector<8x8xf32>
    %cst_19 = arith.constant 0xFF800000 : f32
    %46 = vector.broadcast %cst_19 : f32 to vector<8x8xf32>
    %47 = arith.select %42, %46, %45 : vector<8x8xi1>, vector<8x8xf32>
    %cst_20 = arith.constant dense<0xFF800000> : vector<8xf32>
    %48 = vector.multi_reduction <maximumf>, %47, %cst_20 [1] : vector<8x8xf32> to vector<8xf32>
    %49 = vector.shape_cast %48 : vector<8xf32> to vector<8x1xf32>
    %50 = vector.broadcast %49 : vector<8x1xf32> to vector<8x8xf32>
    %51 = arith.subf %47, %50 : vector<8x8xf32>
    %52 = math.exp %51 : vector<8x8xf32>
    %cst_21 = arith.constant dense<0.000000e+00> : vector<8xf32>
    %53 = vector.multi_reduction <add>, %52, %cst_21 [1] : vector<8x8xf32> to vector<8xf32>
    %54 = vector.shape_cast %53 : vector<8xf32> to vector<8x1xf32>
    %55 = tpu.reciprocal %54 {approx = true} : vector<8x1xf32> -> vector<8x1xf32>
    %56 = vector.broadcast %55 : vector<8x1xf32> to vector<8x8xf32>
    %57 = arith.mulf %52, %56 : vector<8x8xf32>
    %58 = arith.truncf %57 : vector<8x8xf32> to vector<8x8xbf16>
    %59 = vector.extract_strided_slice %39 {offsets = [0, 0], sizes = [8, 8], strides = [1, 1]} : vector<8x32xbf16> to vector<8x8xbf16>
    %cst_22 = arith.constant dense<0.000000e+00> : vector<8x8xf32>
    %60 = tpu.matmul %58, %59, %cst_22 {dimension_numbers = #tpu.dot_dimension_numbers<[1], [0], [0], [1], [0, 0, 1, 1], [], []>} : vector<8x8xbf16>, vector<8x8xbf16>, vector<8x8xf32> -> vector<8x8xf32>
    %61 = vector.extract_strided_slice %37 {offsets = [0, 8], sizes = [8, 8], strides = [1, 1]} : vector<8x32xbf16> to vector<8x8xbf16>
    %62 = vector.extract_strided_slice %38 {offsets = [0, 8], sizes = [8, 8], strides = [1, 1]} : vector<8x32xbf16> to vector<8x8xbf16>
    %cst_23 = arith.constant dense<0.000000e+00> : vector<8x8xf32>
    %63 = tpu.matmul %61, %62, %cst_23 {dimension_numbers = #tpu.dot_dimension_numbers<[1], [1], [0], [0], [0, 0, 1, 0], [], []>} : vector<8x8xbf16>, vector<8x8xbf16>, vector<8x8xf32> -> vector<8x8xf32>
    %cst_24 = arith.constant 0xFF800000 : f32
    %64 = vector.broadcast %cst_24 : f32 to vector<8x8xf32>
    %65 = arith.select %42, %64, %63 : vector<8x8xi1>, vector<8x8xf32>
    %cst_25 = arith.constant dense<0xFF800000> : vector<8xf32>
    %66 = vector.multi_reduction <maximumf>, %65, %cst_25 [1] : vector<8x8xf32> to vector<8xf32>
    %67 = vector.shape_cast %66 : vector<8xf32> to vector<8x1xf32>
    %68 = vector.broadcast %67 : vector<8x1xf32> to vector<8x8xf32>
    %69 = arith.subf %65, %68 : vector<8x8xf32>
    %70 = math.exp %69 : vector<8x8xf32>
    %cst_26 = arith.constant dense<0.000000e+00> : vector<8xf32>
    %71 = vector.multi_reduction <add>, %70, %cst_26 [1] : vector<8x8xf32> to vector<8xf32>
    %72 = vector.shape_cast %71 : vector<8xf32> to vector<8x1xf32>
    %73 = tpu.reciprocal %72 {approx = true} : vector<8x1xf32> -> vector<8x1xf32>
    %74 = vector.broadcast %73 : vector<8x1xf32> to vector<8x8xf32>
    %75 = arith.mulf %70, %74 : vector<8x8xf32>
    %76 = arith.truncf %75 : vector<8x8xf32> to vector<8x8xbf16>
    %77 = vector.extract_strided_slice %39 {offsets = [0, 8], sizes = [8, 8], strides = [1, 1]} : vector<8x32xbf16> to vector<8x8xbf16>
    %cst_27 = arith.constant dense<0.000000e+00> : vector<8x8xf32>
    %78 = tpu.matmul %76, %77, %cst_27 {dimension_numbers = #tpu.dot_dimension_numbers<[1], [0], [0], [1], [0, 0, 1, 1], [], []>} : vector<8x8xbf16>, vector<8x8xbf16>, vector<8x8xf32> -> vector<8x8xf32>
    %79 = vector.extract_strided_slice %37 {offsets = [0, 16], sizes = [8, 8], strides = [1, 1]} : vector<8x32xbf16> to vector<8x8xbf16>
    %80 = vector.extract_strided_slice %38 {offsets = [0, 16], sizes = [8, 8], strides = [1, 1]} : vector<8x32xbf16> to vector<8x8xbf16>
    %cst_28 = arith.constant dense<0.000000e+00> : vector<8x8xf32>
    %81 = tpu.matmul %79, %80, %cst_28 {dimension_numbers = #tpu.dot_dimension_numbers<[1], [1], [0], [0], [0, 0, 1, 0], [], []>} : vector<8x8xbf16>, vector<8x8xbf16>, vector<8x8xf32> -> vector<8x8xf32>
    %cst_29 = arith.constant 0xFF800000 : f32
    %82 = vector.broadcast %cst_29 : f32 to vector<8x8xf32>
    %83 = arith.select %42, %82, %81 : vector<8x8xi1>, vector<8x8xf32>
    %cst_30 = arith.constant dense<0xFF800000> : vector<8xf32>
    %84 = vector.multi_reduction <maximumf>, %83, %cst_30 [1] : vector<8x8xf32> to vector<8xf32>
    %85 = vector.shape_cast %84 : vector<8xf32> to vector<8x1xf32>
    %86 = vector.broadcast %85 : vector<8x1xf32> to vector<8x8xf32>
    %87 = arith.subf %83, %86 : vector<8x8xf32>
    %88 = math.exp %87 : vector<8x8xf32>
    %cst_31 = arith.constant dense<0.000000e+00> : vector<8xf32>
    %89 = vector.multi_reduction <add>, %88, %cst_31 [1] : vector<8x8xf32> to vector<8xf32>
    %90 = vector.shape_cast %89 : vector<8xf32> to vector<8x1xf32>
    %91 = tpu.reciprocal %90 {approx = true} : vector<8x1xf32> -> vector<8x1xf32>
    %92 = vector.broadcast %91 : vector<8x1xf32> to vector<8x8xf32>
    %93 = arith.mulf %88, %92 : vector<8x8xf32>
    %94 = arith.truncf %93 : vector<8x8xf32> to vector<8x8xbf16>
    %95 = vector.extract_strided_slice %39 {offsets = [0, 16], sizes = [8, 8], strides = [1, 1]} : vector<8x32xbf16> to vector<8x8xbf16>
    %cst_32 = arith.constant dense<0.000000e+00> : vector<8x8xf32>
    %96 = tpu.matmul %94, %95, %cst_32 {dimension_numbers = #tpu.dot_dimension_numbers<[1], [0], [0], [1], [0, 0, 1, 1], [], []>} : vector<8x8xbf16>, vector<8x8xbf16>, vector<8x8xf32> -> vector<8x8xf32>
    %97 = vector.extract_strided_slice %37 {offsets = [0, 24], sizes = [8, 8], strides = [1, 1]} : vector<8x32xbf16> to vector<8x8xbf16>
    %98 = vector.extract_strided_slice %38 {offsets = [0, 24], sizes = [8, 8], strides = [1, 1]} : vector<8x32xbf16> to vector<8x8xbf16>
    %cst_33 = arith.constant dense<0.000000e+00> : vector<8x8xf32>
    %99 = tpu.matmul %97, %98, %cst_33 {dimension_numbers = #tpu.dot_dimension_numbers<[1], [1], [0], [0], [0, 0, 1, 0], [], []>} : vector<8x8xbf16>, vector<8x8xbf16>, vector<8x8xf32> -> vector<8x8xf32>
    %cst_34 = arith.constant 0xFF800000 : f32
    %100 = vector.broadcast %cst_34 : f32 to vector<8x8xf32>
    %101 = arith.select %42, %100, %99 : vector<8x8xi1>, vector<8x8xf32>
    %cst_35 = arith.constant dense<0xFF800000> : vector<8xf32>
    %102 = vector.multi_reduction <maximumf>, %101, %cst_35 [1] : vector<8x8xf32> to vector<8xf32>
    %103 = vector.shape_cast %102 : vector<8xf32> to vector<8x1xf32>
    %104 = vector.broadcast %103 : vector<8x1xf32> to vector<8x8xf32>
    %105 = arith.subf %101, %104 : vector<8x8xf32>
    %106 = math.exp %105 : vector<8x8xf32>
    %cst_36 = arith.constant dense<0.000000e+00> : vector<8xf32>
    %107 = vector.multi_reduction <add>, %106, %cst_36 [1] : vector<8x8xf32> to vector<8xf32>
    %108 = vector.shape_cast %107 : vector<8xf32> to vector<8x1xf32>
    %109 = tpu.reciprocal %108 {approx = true} : vector<8x1xf32> -> vector<8x1xf32>
    %110 = vector.broadcast %109 : vector<8x1xf32> to vector<8x8xf32>
    %111 = arith.mulf %106, %110 : vector<8x8xf32>
    %112 = arith.truncf %111 : vector<8x8xf32> to vector<8x8xbf16>
    %113 = vector.extract_strided_slice %39 {offsets = [0, 24], sizes = [8, 8], strides = [1, 1]} : vector<8x32xbf16> to vector<8x8xbf16>
    %cst_37 = arith.constant dense<0.000000e+00> : vector<8x8xf32>
    %114 = tpu.matmul %112, %113, %cst_37 {dimension_numbers = #tpu.dot_dimension_numbers<[1], [0], [0], [1], [0, 0, 1, 1], [], []>} : vector<8x8xbf16>, vector<8x8xbf16>, vector<8x8xf32> -> vector<8x8xf32>
    %115 = tpu.concatenate %60, %78, %96, %114 in 1 : vector<8x8xf32>, vector<8x8xf32>, vector<8x8xf32>, vector<8x8xf32> -> vector<8x32xf32>
    %c0_38 = arith.constant 0 : index
    %c0_39 = arith.constant 0 : index
    %116 = vector.load %arg11[%c0_38, %c0_39] : memref<32x32xbf16, #tpu.memory_space<vmem>>, vector<32x32xbf16>
    %c0_40 = arith.constant 0 : index
    %c0_41 = arith.constant 0 : index
    %117 = vector.load %arg12[%c0_40, %c0_41] : memref<1x32xf32, #tpu.memory_space<vmem>>, vector<1x32xf32>
    %118 = arith.truncf %115 : vector<8x32xf32> to vector<8x32xbf16>
    %cst_42 = arith.constant dense<0.000000e+00> : vector<8x32xf32>
    %119 = tpu.matmul %118, %116, %cst_42 {dimension_numbers = #tpu.dot_dimension_numbers<[1], [0], [0], [1], [0, 0, 1, 1], [], []>} : vector<8x32xbf16>, vector<32x32xbf16>, vector<8x32xf32> -> vector<8x32xf32>
    %120 = vector.broadcast %117 : vector<1x32xf32> to vector<8x32xf32>
    %121 = arith.addf %119, %120 : vector<8x32xf32>
    %122 = arith.addf %1, %121 : vector<8x32xf32>
    %c0_43 = arith.constant 0 : index
    %c0_44 = arith.constant 0 : index
    %123 = vector.load %arg5[%c0_43, %c0_44] : memref<1x32xf32, #tpu.memory_space<vmem>>, vector<1x32xf32>
    %c0_45 = arith.constant 0 : index
    %c0_46 = arith.constant 0 : index
    %124 = vector.load %arg6[%c0_45, %c0_46] : memref<1x32xf32, #tpu.memory_space<vmem>>, vector<1x32xf32>
    %cst_47 = arith.constant dense<0.000000e+00> : vector<8xf32>
    %125 = vector.multi_reduction <add>, %122, %cst_47 [1] : vector<8x32xf32> to vector<8xf32>
    %126 = vector.shape_cast %125 : vector<8xf32> to vector<8x1xf32>
    %cst_48 = arith.constant 3.200000e+01 : f32
    %127 = vector.broadcast %cst_48 : f32 to vector<8x1xf32>
    %128 = arith.divf %126, %127 : vector<8x1xf32>
    %129 = vector.broadcast %128 : vector<8x1xf32> to vector<8x32xf32>
    %130 = arith.subf %122, %129 : vector<8x32xf32>
    %131 = arith.mulf %130, %130 : vector<8x32xf32>
    %cst_49 = arith.constant dense<0.000000e+00> : vector<8xf32>
    %132 = vector.multi_reduction <add>, %131, %cst_49 [1] : vector<8x32xf32> to vector<8xf32>
    %133 = vector.shape_cast %132 : vector<8xf32> to vector<8x1xf32>
    %cst_50 = arith.constant 3.200000e+01 : f32
    %134 = vector.broadcast %cst_50 : f32 to vector<8x1xf32>
    %135 = arith.divf %133, %134 : vector<8x1xf32>
    %136 = vector.broadcast %128 : vector<8x1xf32> to vector<8x32xf32>
    %137 = arith.subf %122, %136 : vector<8x32xf32>
    %cst_51 = arith.constant 9.99999974E-6 : f32
    %138 = vector.broadcast %cst_51 : f32 to vector<8x1xf32>
    %139 = arith.addf %135, %138 : vector<8x1xf32>
    %140 = math.rsqrt %139 : vector<8x1xf32>
    %141 = vector.broadcast %140 : vector<8x1xf32> to vector<8x32xf32>
    %142 = arith.mulf %137, %141 : vector<8x32xf32>
    %143 = vector.broadcast %123 : vector<1x32xf32> to vector<8x32xf32>
    %144 = arith.mulf %142, %143 : vector<8x32xf32>
    %145 = vector.broadcast %124 : vector<1x32xf32> to vector<8x32xf32>
    %146 = arith.addf %144, %145 : vector<8x32xf32>
    %c0_52 = arith.constant 0 : index
    %c0_53 = arith.constant 0 : index
    %147 = vector.load %arg13[%c0_52, %c0_53] : memref<32x32xbf16, #tpu.memory_space<vmem>>, vector<32x32xbf16>
    %c0_54 = arith.constant 0 : index
    %c0_55 = arith.constant 0 : index
    %148 = vector.load %arg14[%c0_54, %c0_55] : memref<1x32xf32, #tpu.memory_space<vmem>>, vector<1x32xf32>
    %149 = arith.truncf %146 : vector<8x32xf32> to vector<8x32xbf16>
    %cst_56 = arith.constant dense<0.000000e+00> : vector<8x32xf32>
    %150 = tpu.matmul %149, %147, %cst_56 {dimension_numbers = #tpu.dot_dimension_numbers<[1], [0], [0], [1], [0, 0, 1, 1], [], []>} : vector<8x32xbf16>, vector<32x32xbf16>, vector<8x32xf32> -> vector<8x32xf32>
    %151 = vector.broadcast %148 : vector<1x32xf32> to vector<8x32xf32>
    %152 = arith.addf %150, %151 : vector<8x32xf32>
    %c0_57 = arith.constant 0 : index
    %c0_58 = arith.constant 0 : index
    %153 = vector.load %arg15[%c0_57, %c0_58] : memref<32x64xbf16, #tpu.memory_space<vmem>>, vector<32x64xbf16>
    %c0_59 = arith.constant 0 : index
    %c0_60 = arith.constant 0 : index
    %154 = vector.load %arg16[%c0_59, %c0_60] : memref<1x64xf32, #tpu.memory_space<vmem>>, vector<1x64xf32>
    %155 = arith.truncf %3 : vector<8x32xf32> to vector<8x32xbf16>
    %cst_61 = arith.constant dense<0.000000e+00> : vector<8x64xf32>
    %156 = tpu.matmul %155, %153, %cst_61 {dimension_numbers = #tpu.dot_dimension_numbers<[1], [0], [0], [1], [0, 0, 1, 1], [], []>} : vector<8x32xbf16>, vector<32x64xbf16>, vector<8x64xf32> -> vector<8x64xf32>
    %157 = vector.broadcast %154 : vector<1x64xf32> to vector<8x64xf32>
    %158 = arith.addf %156, %157 : vector<8x64xf32>
    %159 = vector.extract_strided_slice %158 {offsets = [0, 0], sizes = [8, 32], strides = [1, 1]} : vector<8x64xf32> to vector<8x32xf32>
    %160 = vector.extract_strided_slice %158 {offsets = [0, 32], sizes = [8, 32], strides = [1, 1]} : vector<8x64xf32> to vector<8x32xf32>
    %161 = arith.truncf %152 : vector<8x32xf32> to vector<8x32xbf16>
    %162 = arith.truncf %159 : vector<8x32xf32> to vector<8x32xbf16>
    %163 = arith.truncf %160 : vector<8x32xf32> to vector<8x32xbf16>
    %164 = vector.extract_strided_slice %161 {offsets = [0, 0], sizes = [8, 8], strides = [1, 1]} : vector<8x32xbf16> to vector<8x8xbf16>
    %165 = vector.extract_strided_slice %162 {offsets = [0, 0], sizes = [8, 8], strides = [1, 1]} : vector<8x32xbf16> to vector<8x8xbf16>
    %cst_62 = arith.constant dense<0.000000e+00> : vector<8x8xf32>
    %166 = tpu.matmul %164, %165, %cst_62 {dimension_numbers = #tpu.dot_dimension_numbers<[1], [1], [0], [0], [0, 0, 1, 0], [], []>} : vector<8x8xbf16>, vector<8x8xbf16>, vector<8x8xf32> -> vector<8x8xf32>
    %cst_63 = arith.constant dense<0xFF800000> : vector<8xf32>
    %167 = vector.multi_reduction <maximumf>, %166, %cst_63 [1] : vector<8x8xf32> to vector<8xf32>
    %168 = vector.shape_cast %167 : vector<8xf32> to vector<8x1xf32>
    %169 = vector.broadcast %168 : vector<8x1xf32> to vector<8x8xf32>
    %170 = arith.subf %166, %169 : vector<8x8xf32>
    %171 = math.exp %170 : vector<8x8xf32>
    %cst_64 = arith.constant dense<0.000000e+00> : vector<8xf32>
    %172 = vector.multi_reduction <add>, %171, %cst_64 [1] : vector<8x8xf32> to vector<8xf32>
    %173 = vector.shape_cast %172 : vector<8xf32> to vector<8x1xf32>
    %174 = tpu.reciprocal %173 {approx = true} : vector<8x1xf32> -> vector<8x1xf32>
    %175 = vector.broadcast %174 : vector<8x1xf32> to vector<8x8xf32>
    %176 = arith.mulf %171, %175 : vector<8x8xf32>
    %177 = arith.truncf %176 : vector<8x8xf32> to vector<8x8xbf16>
    %178 = vector.extract_strided_slice %163 {offsets = [0, 0], sizes = [8, 8], strides = [1, 1]} : vector<8x32xbf16> to vector<8x8xbf16>
    %cst_65 = arith.constant dense<0.000000e+00> : vector<8x8xf32>
    %179 = tpu.matmul %177, %178, %cst_65 {dimension_numbers = #tpu.dot_dimension_numbers<[1], [0], [0], [1], [0, 0, 1, 1], [], []>} : vector<8x8xbf16>, vector<8x8xbf16>, vector<8x8xf32> -> vector<8x8xf32>
    %180 = vector.extract_strided_slice %161 {offsets = [0, 8], sizes = [8, 8], strides = [1, 1]} : vector<8x32xbf16> to vector<8x8xbf16>
    %181 = vector.extract_strided_slice %162 {offsets = [0, 8], sizes = [8, 8], strides = [1, 1]} : vector<8x32xbf16> to vector<8x8xbf16>
    %cst_66 = arith.constant dense<0.000000e+00> : vector<8x8xf32>
    %182 = tpu.matmul %180, %181, %cst_66 {dimension_numbers = #tpu.dot_dimension_numbers<[1], [1], [0], [0], [0, 0, 1, 0], [], []>} : vector<8x8xbf16>, vector<8x8xbf16>, vector<8x8xf32> -> vector<8x8xf32>
    %cst_67 = arith.constant dense<0xFF800000> : vector<8xf32>
    %183 = vector.multi_reduction <maximumf>, %182, %cst_67 [1] : vector<8x8xf32> to vector<8xf32>
    %184 = vector.shape_cast %183 : vector<8xf32> to vector<8x1xf32>
    %185 = vector.broadcast %184 : vector<8x1xf32> to vector<8x8xf32>
    %186 = arith.subf %182, %185 : vector<8x8xf32>
    %187 = math.exp %186 : vector<8x8xf32>
    %cst_68 = arith.constant dense<0.000000e+00> : vector<8xf32>
    %188 = vector.multi_reduction <add>, %187, %cst_68 [1] : vector<8x8xf32> to vector<8xf32>
    %189 = vector.shape_cast %188 : vector<8xf32> to vector<8x1xf32>
    %190 = tpu.reciprocal %189 {approx = true} : vector<8x1xf32> -> vector<8x1xf32>
    %191 = vector.broadcast %190 : vector<8x1xf32> to vector<8x8xf32>
    %192 = arith.mulf %187, %191 : vector<8x8xf32>
    %193 = arith.truncf %192 : vector<8x8xf32> to vector<8x8xbf16>
    %194 = vector.extract_strided_slice %163 {offsets = [0, 8], sizes = [8, 8], strides = [1, 1]} : vector<8x32xbf16> to vector<8x8xbf16>
    %cst_69 = arith.constant dense<0.000000e+00> : vector<8x8xf32>
    %195 = tpu.matmul %193, %194, %cst_69 {dimension_numbers = #tpu.dot_dimension_numbers<[1], [0], [0], [1], [0, 0, 1, 1], [], []>} : vector<8x8xbf16>, vector<8x8xbf16>, vector<8x8xf32> -> vector<8x8xf32>
    %196 = vector.extract_strided_slice %161 {offsets = [0, 16], sizes = [8, 8], strides = [1, 1]} : vector<8x32xbf16> to vector<8x8xbf16>
    %197 = vector.extract_strided_slice %162 {offsets = [0, 16], sizes = [8, 8], strides = [1, 1]} : vector<8x32xbf16> to vector<8x8xbf16>
    %cst_70 = arith.constant dense<0.000000e+00> : vector<8x8xf32>
    %198 = tpu.matmul %196, %197, %cst_70 {dimension_numbers = #tpu.dot_dimension_numbers<[1], [1], [0], [0], [0, 0, 1, 0], [], []>} : vector<8x8xbf16>, vector<8x8xbf16>, vector<8x8xf32> -> vector<8x8xf32>
    %cst_71 = arith.constant dense<0xFF800000> : vector<8xf32>
    %199 = vector.multi_reduction <maximumf>, %198, %cst_71 [1] : vector<8x8xf32> to vector<8xf32>
    %200 = vector.shape_cast %199 : vector<8xf32> to vector<8x1xf32>
    %201 = vector.broadcast %200 : vector<8x1xf32> to vector<8x8xf32>
    %202 = arith.subf %198, %201 : vector<8x8xf32>
    %203 = math.exp %202 : vector<8x8xf32>
    %cst_72 = arith.constant dense<0.000000e+00> : vector<8xf32>
    %204 = vector.multi_reduction <add>, %203, %cst_72 [1] : vector<8x8xf32> to vector<8xf32>
    %205 = vector.shape_cast %204 : vector<8xf32> to vector<8x1xf32>
    %206 = tpu.reciprocal %205 {approx = true} : vector<8x1xf32> -> vector<8x1xf32>
    %207 = vector.broadcast %206 : vector<8x1xf32> to vector<8x8xf32>
    %208 = arith.mulf %203, %207 : vector<8x8xf32>
    %209 = arith.truncf %208 : vector<8x8xf32> to vector<8x8xbf16>
    %210 = vector.extract_strided_slice %163 {offsets = [0, 16], sizes = [8, 8], strides = [1, 1]} : vector<8x32xbf16> to vector<8x8xbf16>
    %cst_73 = arith.constant dense<0.000000e+00> : vector<8x8xf32>
    %211 = tpu.matmul %209, %210, %cst_73 {dimension_numbers = #tpu.dot_dimension_numbers<[1], [0], [0], [1], [0, 0, 1, 1], [], []>} : vector<8x8xbf16>, vector<8x8xbf16>, vector<8x8xf32> -> vector<8x8xf32>
    %212 = vector.extract_strided_slice %161 {offsets = [0, 24], sizes = [8, 8], strides = [1, 1]} : vector<8x32xbf16> to vector<8x8xbf16>
    %213 = vector.extract_strided_slice %162 {offsets = [0, 24], sizes = [8, 8], strides = [1, 1]} : vector<8x32xbf16> to vector<8x8xbf16>
    %cst_74 = arith.constant dense<0.000000e+00> : vector<8x8xf32>
    %214 = tpu.matmul %212, %213, %cst_74 {dimension_numbers = #tpu.dot_dimension_numbers<[1], [1], [0], [0], [0, 0, 1, 0], [], []>} : vector<8x8xbf16>, vector<8x8xbf16>, vector<8x8xf32> -> vector<8x8xf32>
    %cst_75 = arith.constant dense<0xFF800000> : vector<8xf32>
    %215 = vector.multi_reduction <maximumf>, %214, %cst_75 [1] : vector<8x8xf32> to vector<8xf32>
    %216 = vector.shape_cast %215 : vector<8xf32> to vector<8x1xf32>
    %217 = vector.broadcast %216 : vector<8x1xf32> to vector<8x8xf32>
    %218 = arith.subf %214, %217 : vector<8x8xf32>
    %219 = math.exp %218 : vector<8x8xf32>
    %cst_76 = arith.constant dense<0.000000e+00> : vector<8xf32>
    %220 = vector.multi_reduction <add>, %219, %cst_76 [1] : vector<8x8xf32> to vector<8xf32>
    %221 = vector.shape_cast %220 : vector<8xf32> to vector<8x1xf32>
    %222 = tpu.reciprocal %221 {approx = true} : vector<8x1xf32> -> vector<8x1xf32>
    %223 = vector.broadcast %222 : vector<8x1xf32> to vector<8x8xf32>
    %224 = arith.mulf %219, %223 : vector<8x8xf32>
    %225 = arith.truncf %224 : vector<8x8xf32> to vector<8x8xbf16>
    %226 = vector.extract_strided_slice %163 {offsets = [0, 24], sizes = [8, 8], strides = [1, 1]} : vector<8x32xbf16> to vector<8x8xbf16>
    %cst_77 = arith.constant dense<0.000000e+00> : vector<8x8xf32>
    %227 = tpu.matmul %225, %226, %cst_77 {dimension_numbers = #tpu.dot_dimension_numbers<[1], [0], [0], [1], [0, 0, 1, 1], [], []>} : vector<8x8xbf16>, vector<8x8xbf16>, vector<8x8xf32> -> vector<8x8xf32>
    %228 = tpu.concatenate %179, %195, %211, %227 in 1 : vector<8x8xf32>, vector<8x8xf32>, vector<8x8xf32>, vector<8x8xf32> -> vector<8x32xf32>
    %c0_78 = arith.constant 0 : index
    %c0_79 = arith.constant 0 : index
    %229 = vector.load %arg17[%c0_78, %c0_79] : memref<32x32xbf16, #tpu.memory_space<vmem>>, vector<32x32xbf16>
    %c0_80 = arith.constant 0 : index
    %c0_81 = arith.constant 0 : index
    %230 = vector.load %arg18[%c0_80, %c0_81] : memref<1x32xf32, #tpu.memory_space<vmem>>, vector<1x32xf32>
    %231 = arith.truncf %228 : vector<8x32xf32> to vector<8x32xbf16>
    %cst_82 = arith.constant dense<0.000000e+00> : vector<8x32xf32>
    %232 = tpu.matmul %231, %229, %cst_82 {dimension_numbers = #tpu.dot_dimension_numbers<[1], [0], [0], [1], [0, 0, 1, 1], [], []>} : vector<8x32xbf16>, vector<32x32xbf16>, vector<8x32xf32> -> vector<8x32xf32>
    %233 = vector.broadcast %230 : vector<1x32xf32> to vector<8x32xf32>
    %234 = arith.addf %232, %233 : vector<8x32xf32>
    %235 = arith.addf %122, %234 : vector<8x32xf32>
    %c0_83 = arith.constant 0 : index
    %c0_84 = arith.constant 0 : index
    %236 = vector.load %arg7[%c0_83, %c0_84] : memref<1x32xf32, #tpu.memory_space<vmem>>, vector<1x32xf32>
    %c0_85 = arith.constant 0 : index
    %c0_86 = arith.constant 0 : index
    %237 = vector.load %arg8[%c0_85, %c0_86] : memref<1x32xf32, #tpu.memory_space<vmem>>, vector<1x32xf32>
    %cst_87 = arith.constant dense<0.000000e+00> : vector<8xf32>
    %238 = vector.multi_reduction <add>, %235, %cst_87 [1] : vector<8x32xf32> to vector<8xf32>
    %239 = vector.shape_cast %238 : vector<8xf32> to vector<8x1xf32>
    %cst_88 = arith.constant 3.200000e+01 : f32
    %240 = vector.broadcast %cst_88 : f32 to vector<8x1xf32>
    %241 = arith.divf %239, %240 : vector<8x1xf32>
    %242 = vector.broadcast %241 : vector<8x1xf32> to vector<8x32xf32>
    %243 = arith.subf %235, %242 : vector<8x32xf32>
    %244 = arith.mulf %243, %243 : vector<8x32xf32>
    %cst_89 = arith.constant dense<0.000000e+00> : vector<8xf32>
    %245 = vector.multi_reduction <add>, %244, %cst_89 [1] : vector<8x32xf32> to vector<8xf32>
    %246 = vector.shape_cast %245 : vector<8xf32> to vector<8x1xf32>
    %cst_90 = arith.constant 3.200000e+01 : f32
    %247 = vector.broadcast %cst_90 : f32 to vector<8x1xf32>
    %248 = arith.divf %246, %247 : vector<8x1xf32>
    %249 = vector.broadcast %241 : vector<8x1xf32> to vector<8x32xf32>
    %250 = arith.subf %235, %249 : vector<8x32xf32>
    %cst_91 = arith.constant 9.99999974E-6 : f32
    %251 = vector.broadcast %cst_91 : f32 to vector<8x1xf32>
    %252 = arith.addf %248, %251 : vector<8x1xf32>
    %253 = math.rsqrt %252 : vector<8x1xf32>
    %254 = vector.broadcast %253 : vector<8x1xf32> to vector<8x32xf32>
    %255 = arith.mulf %250, %254 : vector<8x32xf32>
    %256 = vector.broadcast %236 : vector<1x32xf32> to vector<8x32xf32>
    %257 = arith.mulf %255, %256 : vector<8x32xf32>
    %258 = vector.broadcast %237 : vector<1x32xf32> to vector<8x32xf32>
    %259 = arith.addf %257, %258 : vector<8x32xf32>
    %c0_92 = arith.constant 0 : index
    %c0_93 = arith.constant 0 : index
    %260 = vector.load %arg19[%c0_92, %c0_93] : memref<32x64xbf16, #tpu.memory_space<vmem>>, vector<32x64xbf16>
    %c0_94 = arith.constant 0 : index
    %c0_95 = arith.constant 0 : index
    %261 = vector.load %arg20[%c0_94, %c0_95] : memref<1x64xf32, #tpu.memory_space<vmem>>, vector<1x64xf32>
    %262 = arith.truncf %259 : vector<8x32xf32> to vector<8x32xbf16>
    %cst_96 = arith.constant dense<0.000000e+00> : vector<8x64xf32>
    %263 = tpu.matmul %262, %260, %cst_96 {dimension_numbers = #tpu.dot_dimension_numbers<[1], [0], [0], [1], [0, 0, 1, 1], [], []>} : vector<8x32xbf16>, vector<32x64xbf16>, vector<8x64xf32> -> vector<8x64xf32>
    %264 = vector.broadcast %261 : vector<1x64xf32> to vector<8x64xf32>
    %265 = arith.addf %263, %264 : vector<8x64xf32>
    %cst_97 = arith.constant 5.000000e-01 : f32
    %266 = vector.broadcast %cst_97 : f32 to vector<8x64xf32>
    %267 = arith.mulf %266, %265 : vector<8x64xf32>
    %cst_98 = arith.constant 0.707106769 : f32
    %268 = vector.broadcast %cst_98 : f32 to vector<8x64xf32>
    %269 = arith.mulf %265, %268 : vector<8x64xf32>
    %270 = math.absf %269 : vector<8x64xf32>
    %cst_99 = arith.constant 0.327591091 : f32
    %271 = vector.broadcast %cst_99 : f32 to vector<8x64xf32>
    %272 = arith.mulf %271, %270 : vector<8x64xf32>
    %cst_100 = arith.constant 1.000000e+00 : f32
    %273 = vector.broadcast %cst_100 : f32 to vector<8x64xf32>
    %274 = arith.addf %273, %272 : vector<8x64xf32>
    %cst_101 = arith.constant 1.000000e+00 : f32
    %275 = vector.broadcast %cst_101 : f32 to vector<8x64xf32>
    %276 = arith.divf %275, %274 : vector<8x64xf32>
    %cst_102 = arith.constant 1.06140542 : f32
    %277 = vector.broadcast %cst_102 : f32 to vector<8x64xf32>
    %278 = arith.mulf %277, %276 : vector<8x64xf32>
    %cst_103 = arith.constant -1.45315206 : f32
    %279 = vector.broadcast %cst_103 : f32 to vector<8x64xf32>
    %280 = arith.addf %278, %279 : vector<8x64xf32>
    %281 = arith.mulf %280, %276 : vector<8x64xf32>
    %cst_104 = arith.constant 1.42141378 : f32
    %282 = vector.broadcast %cst_104 : f32 to vector<8x64xf32>
    %283 = arith.addf %281, %282 : vector<8x64xf32>
    %284 = arith.mulf %283, %276 : vector<8x64xf32>
    %cst_105 = arith.constant -0.284496725 : f32
    %285 = vector.broadcast %cst_105 : f32 to vector<8x64xf32>
    %286 = arith.addf %284, %285 : vector<8x64xf32>
    %287 = arith.mulf %286, %276 : vector<8x64xf32>
    %cst_106 = arith.constant 0.254829586 : f32
    %288 = vector.broadcast %cst_106 : f32 to vector<8x64xf32>
    %289 = arith.addf %287, %288 : vector<8x64xf32>
    %290 = arith.mulf %289, %276 : vector<8x64xf32>
    %cst_107 = arith.constant 0.000000e+00 : f32
    %291 = vector.broadcast %cst_107 : f32 to vector<8x64xf32>
    %292 = arith.subf %291, %270 : vector<8x64xf32>
    %293 = arith.mulf %292, %270 : vector<8x64xf32>
    %294 = math.exp %293 : vector<8x64xf32>
    %295 = arith.mulf %290, %294 : vector<8x64xf32>
    %cst_108 = arith.constant 1.000000e+00 : f32
    %296 = vector.broadcast %cst_108 : f32 to vector<8x64xf32>
    %297 = arith.subf %296, %295 : vector<8x64xf32>
    %cst_109 = arith.constant 0.000000e+00 : f32
    %298 = vector.broadcast %cst_109 : f32 to vector<8x64xf32>
    %299 = arith.cmpf olt, %269, %298 : vector<8x64xf32>
    %cst_110 = arith.constant 0.000000e+00 : f32
    %300 = vector.broadcast %cst_110 : f32 to vector<8x64xf32>
    %301 = arith.subf %300, %297 : vector<8x64xf32>
    %302 = arith.select %299, %301, %297 : vector<8x64xi1>, vector<8x64xf32>
    %cst_111 = arith.constant 1.000000e+00 : f32
    %303 = vector.broadcast %cst_111 : f32 to vector<8x64xf32>
    %304 = arith.addf %303, %302 : vector<8x64xf32>
    %305 = arith.mulf %267, %304 : vector<8x64xf32>
    %c0_112 = arith.constant 0 : index
    %c0_113 = arith.constant 0 : index
    %306 = vector.load %arg21[%c0_112, %c0_113] : memref<64x32xbf16, #tpu.memory_space<vmem>>, vector<64x32xbf16>
    %c0_114 = arith.constant 0 : index
    %c0_115 = arith.constant 0 : index
    %307 = vector.load %arg22[%c0_114, %c0_115] : memref<1x32xf32, #tpu.memory_space<vmem>>, vector<1x32xf32>
    %308 = arith.truncf %305 : vector<8x64xf32> to vector<8x64xbf16>
    %cst_116 = arith.constant dense<0.000000e+00> : vector<8x32xf32>
    %309 = tpu.matmul %308, %306, %cst_116 {dimension_numbers = #tpu.dot_dimension_numbers<[1], [0], [0], [1], [0, 0, 1, 1], [], []>} : vector<8x64xbf16>, vector<64x32xbf16>, vector<8x32xf32> -> vector<8x32xf32>
    %310 = vector.broadcast %307 : vector<1x32xf32> to vector<8x32xf32>
    %311 = arith.addf %309, %310 : vector<8x32xf32>
    %312 = arith.addf %235, %311 : vector<8x32xf32>
    %313 = vector.shape_cast %312 : vector<8x32xf32> to vector<1x8x32xf32>
    %c0_117 = arith.constant 0 : index
    %c0_118 = arith.constant 0 : index
    %c0_119 = arith.constant 0 : index
    %314 = vector.load %arg23[%c0_117, %c0_118, %c0_119] : memref<1x8x32xf32, #tpu.memory_space<vmem>>, vector<1x8x32xf32>
    tpu.vector_store %arg23[%c0_117, %c0_118, %c0_119], %313 {strides = array<i32>} : memref<1x8x32xf32, #tpu.memory_space<vmem>>, vector<1x8x32xf32>,
    return
  }
  func.func @transform_0(%arg0: i32) -> (i32, i32, i32) {
    %c0_i32 = arith.constant 0 : i32
    %c0_i32_0 = arith.constant 0 : i32
    %c0_i32_1 = arith.constant 0 : i32
    return %arg0, %c0_i32, %c0_i32_0 : i32, i32, i32
  }
  func.func @transform_1(%arg0: i32) -> (i32, i32, i32) {
    %c0_i32 = arith.constant 0 : i32
    %c0_i32_0 = arith.constant 0 : i32
    %c0_i32_1 = arith.constant 0 : i32
    return %arg0, %c0_i32, %c0_i32_0 : i32, i32, i32
  }
  func.func @transform_2(%arg0: i32) -> (i32, i32) {
    %c0_i32 = arith.constant 0 : i32
    %c0_i32_0 = arith.constant 0 : i32
    %c0_i32_1 = arith.constant 0 : i32
    return %c0_i32, %c0_i32_0 : i32, i32
  }
  func.func @transform_3(%arg0: i32) -> (i32, i32) {
    %c0_i32 = arith.constant 0 : i32
    %c0_i32_0 = arith.constant 0 : i32
    %c0_i32_1 = arith.constant 0 : i32
    return %c0_i32, %c0_i32_0 : i32, i32
  }
  func.func @transform_4(%arg0: i32) -> (i32, i32) {
    %c0_i32 = arith.constant 0 : i32
    %c0_i32_0 = arith.constant 0 : i32
    %c0_i32_1 = arith.constant 0 : i32
    return %c0_i32, %c0_i32_0 : i32, i32
  }
  func.func @transform_5(%arg0: i32) -> (i32, i32) {
    %c0_i32 = arith.constant 0 : i32
    %c0_i32_0 = arith.constant 0 : i32
    %c0_i32_1 = arith.constant 0 : i32
    return %c0_i32, %c0_i32_0 : i32, i32
  }
  func.func @transform_6(%arg0: i32) -> (i32, i32) {
    %c0_i32 = arith.constant 0 : i32
    %c0_i32_0 = arith.constant 0 : i32
    %c0_i32_1 = arith.constant 0 : i32
    return %c0_i32, %c0_i32_0 : i32, i32
  }
  func.func @transform_7(%arg0: i32) -> (i32, i32) {
    %c0_i32 = arith.constant 0 : i32
    %c0_i32_0 = arith.constant 0 : i32
    %c0_i32_1 = arith.constant 0 : i32
    return %c0_i32, %c0_i32_0 : i32, i32
  }
  func.func @transform_8(%arg0: i32) -> (i32, i32) {
    %c0_i32 = arith.constant 0 : i32
    %c0_i32_0 = arith.constant 0 : i32
    %c0_i32_1 = arith.constant 0 : i32
    return %c0_i32, %c0_i32_0 : i32, i32
  }
  func.func @transform_9(%arg0: i32) -> (i32, i32) {
    %c0_i32 = arith.constant 0 : i32
    %c0_i32_0 = arith.constant 0 : i32
    %c0_i32_1 = arith.constant 0 : i32
    return %c0_i32, %c0_i32_0 : i32, i32
  }
  func.func @transform_10(%arg0: i32) -> (i32, i32) {
    %c0_i32 = arith.constant 0 : i32
    %c0_i32_0 = arith.constant 0 : i32
    %c0_i32_1 = arith.constant 0 : i32
    return %c0_i32, %c0_i32_0 : i32, i32
  }
  func.func @transform_11(%arg0: i32) -> (i32, i32) {
    %c0_i32 = arith.constant 0 : i32
    %c0_i32_0 = arith.constant 0 : i32
    %c0_i32_1 = arith.constant 0 : i32
    return %c0_i32, %c0_i32_0 : i32, i32
  }
  func.func @transform_12(%arg0: i32) -> (i32, i32) {
    %c0_i32 = arith.constant 0 : i32
    %c0_i32_0 = arith.constant 0 : i32
    %c0_i32_1 = arith.constant 0 : i32
    return %c0_i32, %c0_i32_0 : i32, i32
  }
  func.func @transform_13(%arg0: i32) -> (i32, i32) {
    %c0_i32 = arith.constant 0 : i32
    %c0_i32_0 = arith.constant 0 : i32
    %c0_i32_1 = arith.constant 0 : i32
    return %c0_i32, %c0_i32_0 : i32, i32
  }
  func.func @transform_14(%arg0: i32) -> (i32, i32) {
    %c0_i32 = arith.constant 0 : i32
    %c0_i32_0 = arith.constant 0 : i32
    %c0_i32_1 = arith.constant 0 : i32
    return %c0_i32, %c0_i32_0 : i32, i32
  }
  func.func @transform_15(%arg0: i32) -> (i32, i32) {
    %c0_i32 = arith.constant 0 : i32
    %c0_i32_0 = arith.constant 0 : i32
    %c0_i32_1 = arith.constant 0 : i32
    return %c0_i32, %c0_i32_0 : i32, i32
  }
  func.func @transform_16(%arg0: i32) -> (i32, i32) {
    %c0_i32 = arith.constant 0 : i32
    %c0_i32_0 = arith.constant 0 : i32
    %c0_i32_1 = arith.constant 0 : i32
    return %c0_i32, %c0_i32_0 : i32, i32
  }
  func.func @transform_17(%arg0: i32) -> (i32, i32) {
    %c0_i32 = arith.constant 0 : i32
    %c0_i32_0 = arith.constant 0 : i32
    %c0_i32_1 = arith.constant 0 : i32
    return %c0_i32, %c0_i32_0 : i32, i32
  }
  func.func @transform_18(%arg0: i32) -> (i32, i32) {
    %c0_i32 = arith.constant 0 : i32
    %c0_i32_0 = arith.constant 0 : i32
    %c0_i32_1 = arith.constant 0 : i32
    return %c0_i32, %c0_i32_0 : i32, i32
  }
  func.func @transform_19(%arg0: i32) -> (i32, i32) {
    %c0_i32 = arith.constant 0 : i32
    %c0_i32_0 = arith.constant 0 : i32
    %c0_i32_1 = arith.constant 0 : i32
    return %c0_i32, %c0_i32_0 : i32, i32
  }
  func.func @transform_20(%arg0: i32) -> (i32, i32) {
    %c0_i32 = arith.constant 0 : i32
    %c0_i32_0 = arith.constant 0 : i32
    %c0_i32_1 = arith.constant 0 : i32
    return %c0_i32, %c0_i32_0 : i32, i32
  }
  func.func @transform_21(%arg0: i32) -> (i32, i32) {
    %c0_i32 = arith.constant 0 : i32
    %c0_i32_0 = arith.constant 0 : i32
    %c0_i32_1 = arith.constant 0 : i32
    return %c0_i32, %c0_i32_0 : i32, i32
  }
  func.func @transform_22(%arg0: i32) -> (i32, i32, i32) {
    %c0_i32 = arith.constant 0 : i32
    %c0_i32_0 = arith.constant 0 : i32
    %c0_i32_1 = arith.constant 0 : i32
    return %arg0, %c0_i32, %c0_i32_0 : i32, i32, i32
  }
}

</mosaic_0001>

<bundles_post_ra>
// kernel: tpu_custom_call.1
= control target key start
LH: loop header
LB: loop body
LE: loop exit
PB: predicated region body
PF: predicated region fallthrough
CT: control target
= control target key end

     0   :  { %s4423_s0 = inlined_call_operand.vmem [shape: f32[2,8,32], index: 0, kind: input, shape index: {}]   ;;  %s4424_s1 = inlined_call_operand.vmem [shape: f32[2,8,32], index: 1, kind: input, shape index: {}]   ;;  %s4425_s2 = inlined_call_operand.hbm [shape: f32[1,32], index: 2, kind: input, shape index: {}]   ;;  %s4426_s3 = inlined_call_operand.hbm [shape: f32[1,32], index: 3, kind: input, shape index: {}]   ;;  %s4427_s4 = inlined_call_operand.hbm [shape: f32[1,32], index: 4, kind: input, shape index: {}]   ;;  %s4428_s5 = inlined_call_operand.hbm [shape: f32[1,32], index: 5, kind: input, shape index: {}]   ;;  %s4429_s6 = inlined_call_operand.hbm [shape: f32[1,32], index: 6, kind: input, shape index: {}]   ;;  %s4430_s7 = inlined_call_operand.hbm [shape: f32[1,32], index: 7, kind: input, shape index: {}]   ;;  %s4431_s8 = inlined_call_operand.vmem [shape: bf16[32,96], index: 8, kind: input, shape index: {}]   ;;  %s4432_s9 = inlined_call_operand.hbm [shape: f32[1,96], index: 9, kind: input, shape index: {}]   ;;  %s4433_s10 = inlined_call_operand.vmem [shape: bf16[32,32], index: 10, kind: input, shape index: {}]   ;;  %s4434_s11 = inlined_call_operand.hbm [shape: f32[1,32], index: 11, kind: input, shape index: {}]   ;;  %s4435_s12 = inlined_call_operand.hbm [shape: bf16[32,32], index: 12, kind: input, shape index: {}]   ;;  %s4436_s13 = inlined_call_operand.hbm [shape: f32[1,32], index: 13, kind: input, shape index: {}]   ;;  %s4437_s14 = inlined_call_operand.vmem [shape: bf16[32,64], index: 14, kind: input, shape index: {}]   ;;  %s4438_s15 = inlined_call_operand.hbm [shape: f32[1,64], index: 15, kind: input, shape index: {}]   ;;  %s4439_s16 = inlined_call_operand.hbm [shape: bf16[32,32], index: 16, kind: input, shape index: {}]   ;;  %s4440_s17 = inlined_call_operand.hbm [shape: f32[1,32], index: 17, kind: input, shape index: {}]   ;;  %s4441_s18 = inlined_call_operand.vmem [shape: bf16[32,64], index: 18, kind: input, shape index: {}]   ;;  %s4442_s19 = inlined_call_operand.vmem [shape: f32[1,64], index: 19, kind: input, shape index: {}]   ;;  %s4443_s20 = inlined_call_operand.vmem [shape: bf16[64,32], index: 20, kind: input, shape index: {}]   ;;  %s4444_s21 = inlined_call_operand.vmem [shape: f32[1,32], index: 21, kind: input, shape index: {}]   ;;  %s4445_s22 = inlined_call_operand.hbm [shape: f32[2,8,32], index: 22, kind: output, shape index: {}]  }
   0x1   :  { %4471 = sst [smem:[#allocation40_spill]] %s4423_s0 }
   0x2   :  { %4472 = sst [smem:[#allocation41_spill]] %s4424_s1 }
   0x3   :  { %4473 = sst [smem:[#allocation42_spill]] %s4425_s2 }
   0x4   :  { %4474 = sst [smem:[#allocation43_spill]] %s4426_s3 }
   0x5   :  { %4475 = sst [smem:[#allocation44_spill]] %s4427_s4 }
   0x6   :  { %4476 = sst [smem:[#allocation45_spill]] %s4428_s5 }
   0x7   :  { %4477 = sst [smem:[#allocation46_spill]] %s4429_s6 }
   0x8   :  { %4478 = sst [smem:[#allocation47_spill]] %s4430_s7 }
   0x9   :  { %4479 = sst [smem:[#allocation48_spill]] %s4434_s11 }
   0xa   :  { %4480 = sst [smem:[#allocation49_spill]] %s4436_s13 }
   0xb   :  { %4481 = sst [smem:[#allocation50_spill]] %s4442_s19 }
   0xc   :  { %4482 = sst [smem:[#allocation51_spill]] %s4444_s21 }
   0xd   :  { %4483 = sst [smem:[#allocation52_spill]] %s4445_s22 }
   0xe   :  { %27 = vsyncpa [#allocation3], 0 }
   0xf   :  { %28 = vsyncpa [#allocation6], 0 }
  0x10   :  { %29 = vsyncpa [#allocation9], 0 }
  0x11   :  { %30 = vsyncpa [#allocation12], 0 }
  0x12   :  { %31 = vsyncpa [#allocation15], 0 }
  0x13   :  { %32 = vsyncpa [#allocation18], 0 }
  0x14   :  { %33 = vsyncpa [#allocation21], 0 }
  0x15   :  { %34 = vsyncpa [#allocation4], 0 }
  0x16   :  { %36 = vsyncpa [#allocation4 + $0x1], 0  ;;  %s3755_s3 = smov 0   ;;  %s3757_s28 = smov 0  }
  0x17   :  { %4484 = sst [smem:[#allocation32_spill]] %s3755_s3  ;;  %s3759_s29 = smov 0  }
  0x18   :  { %s3761_s30 = smov 0  }
  0x19 LB: > { %s4486_s3 = sld [smem:[#allocation32_spill]]  ;;  %4488 = sst [smem:[#allocation33_spill]] %s3598_s28  ;;  %s3606_s30 = sphi %s3761_s30, %s4541_s30   ;;  %s3602_s29 = sphi %s3759_s29, %s4544_s29   ;;  %s3598_s28 = sphi %s3757_s28, %s4543_s28  }
  0x1a   : > { %4489 = sst [smem:[#allocation34_spill]] %s3602_s29  ;;  %s3776_s4 = sadd.s32 4294967295, %s3606_s30  }
  0x1b   : > { %4490 = sst [smem:[#allocation35_spill]] %s3606_s30  ;;  %s2606_s0 = sadd.s32 4294967294, %s3606_s30  }
  0x1c   : > { %s3780_s23 = sadd.s32 1, %s3606_s30   ;;  %s521_s1 = sadd.s32 1, %s3602_s29 }
  0x1d   : > { %4491 = sst [smem:[#allocation36_spill]] %s3780_s23  ;;  %s518_s5 = ssub.s32 %s3606_s30, %s3780_s23 }
  0x1e   : > { %p531_p0 = scmp.ne.s32.totalorder %s3602_s29, %s3598_s28  ;;  %p519_p1 = scmp.eq.s32.totalorder %s518_s5, 0 }
  0x1f   : > { %4487 = sst [smem:[#allocation32_spill]] %s4486_s3  ;;  %p532_p2 = scmp.eq.s32.totalorder %s3776_s4, 1 }
  0x20   : > { %p537_p3 = scmp.ne.s32.totalorder %s3598_s28, %s4486_s3  ;;  %p538_p4 = scmp.eq.s32.totalorder %s2606_s0, 1 }
  0x21   : > { %s3791_s24 = scalar_select %p519_p1, %s3602_s29, %s521_s1  }
  0x22   : > { %p3793_p5 = por %p532_p2, %p531_p0  ;;  %p3797_p6 = por %p538_p4, %p537_p3 }
  0x23   : > { %4492 = sst [smem:[#allocation37_spill]] %s3791_s24  ;;  %p2607_p7 = scmp.ge.s32.totalorder %s3606_s30, 1 }
  0x24   : > { %s4493_s6 = scalar_select %p3793_p5, 1, 0 }
  0x25   : > { %s4495_s25 = scalar_select %p3797_p6, 1, 0 }
  0x26   : > { %4494 = sst [smem:[#allocation38_spill]] %s4493_s6  ;;  %p545_p8 = scmp.lt.s32.totalorder %s3606_s30, 3 }
  0x27   : > { %4496 = sst [smem:[#allocation39_spill]] %s4495_s25  ;;  %p4460_p9 = scmp.eq.s32.totalorder %s3776_s4, 0 }
  0x28   : > { %p3804_p10 = pnand %p2607_p7, %p545_p8  ;;  %s3608_s2 = smov [#allocation5]  }
  0x29   : > { %s569_s27 = sshll.u32 %s3608_s2, 4  ;;  %s3609_s0 = smov [#allocation8]   ;;  %s570_s27 = int_to_ptr.vmem [resolvable:$true] %s569_s27 }
  0x2a   : > { %s4497_s26 = scalar_select %p3804_p10, 1, 0 }
  0x2b   : > { %p2960_p11 = pneg %p3804_p10  ;;  %s591_s1 = sshll.u32 %s3609_s0, 4  ;;  %s3816_s1 = int_to_ptr.vmem [resolvable:$true] %s591_s1 }
  0x2c   : > { %s3610_s24 = smov [#allocation11]   ;;  %s4499_s2 = sld [smem:[#allocation43_spill]] }
  0x2d   : > { %p3812_p12 = pnand %p4460_p9, %p2960_p11  ;;  %s613_s29 = sshll.u32 %s3610_s24, 4  ;;  %s3818_s29 = int_to_ptr.vmem [resolvable:$true] %s613_s29 }
  0x2f   : > { %p3828_p0 = pneg %p3812_p12 }
  0x32   : > { %s3152_s3 = scalar_lea.hbm %s4499_s2, 16 }
  0x33   : > { %p3153_p13 = scmp.ne.s32.totalorder %s4499_s2, %s3152_s3  ;;  %p3159_p3 = scmp.lt.u32.totalorder %s3152_s3, %s4499_s2 }
  0x35   : > { %p3155_p1 = pnand %p3828_p0, %p3153_p13 }
  0x37   : > { %p3156_p2 = pneg %p3155_p1 }
  0x39   : > { %p3161_p4 = pnand %p3159_p3, %p3156_p2 }
  0x3b   : > { %3164 = shalt.err (!%p3161_p4)
}
  0x3c   : > { %s3165_s23 = scalar_lea.vmem %s570_s27, 16  ;;  %s3172_s22 = scalar_lea.vmem %s570_s27, 32 }
  0x3d   : > { %p3166_p7 = scmp.ne.s32.totalorder %s570_s27, %s3165_s23  ;;  %p3173_p9 = scmp.lt.s32.totalorder %s570_s27, %s570_s27 }
  0x3e   : > { %p3174_p6 = scmp.lt.s32.totalorder %s3172_s22, %s3165_s23 }
  0x3f   : > { %p3168_p8 = pnand %p3166_p7, %p3828_p0 }
  0x40   : > { %p3175_p5 = por %p3174_p6, %p3173_p9 }
  0x41   : > { %p3169_p11 = pneg %p3168_p8 }
  0x43   : > { %p3176_p10 = pnand %p3175_p5, %p3169_p11 }
  0x45   : > { %3179 = shalt.err (!%p3176_p10)
}
  0x46   : > { %2966 = dma.hbm_to_vmem [thread:$0]  (!%p3812_p12), %s4499_s2, 16, %s570_s27, [#allocation6]  }
  0x47   : > { %s4501_s24 = sld [smem:[#allocation45_spill]] }
  0x4d   : > { %s3180_s21 = scalar_lea.hbm %s4501_s24, 16 }
  0x4e   : > { %p3181_p13 = scmp.ne.s32.totalorder %s4501_s24, %s3180_s21  ;;  %p3187_p5 = scmp.lt.u32.totalorder %s3180_s21, %s4501_s24 }
  0x50   : > { %p3183_p1 = pnand %p3181_p13, %p3828_p0 }
  0x52   : > { %p3184_p6 = pneg %p3183_p1 }
  0x54   : > { %p3189_p9 = pnand %p3187_p5, %p3184_p6 }
  0x56   : > { %3192 = shalt.err (!%p3189_p9)
}
  0x57   : > { %s3193_s27 = scalar_lea.vmem %s3816_s1, 16  ;;  %s3200_s19 = scalar_lea.vmem %s3816_s1, 32 }
  0x58   : > { %p3194_p10 = scmp.ne.s32.totalorder %s3816_s1, %s3193_s27  ;;  %p3201_p4 = scmp.lt.s32.totalorder %s3816_s1, %s3816_s1 }
  0x59   : > { %p3202_p7 = scmp.lt.s32.totalorder %s3200_s19, %s3193_s27 }
  0x5a   : > { %p3196_p2 = pnand %p3194_p10, %p3828_p0 }
  0x5b   : > { %p3203_p8 = por %p3202_p7, %p3201_p4 }
  0x5c   : > { %p3197_p3 = pneg %p3196_p2 }
  0x5e   : > { %p3204_p11 = pnand %p3203_p8, %p3197_p3 }
  0x60   : > { %3207 = shalt.err (!%p3204_p11)
}
  0x61   : > { %2972 = dma.hbm_to_vmem [thread:$0]  (!%p3812_p12), %s4501_s24, 16, %s3816_s1, [#allocation9]  }
  0x62   : > { %s4502_s7 = sld [smem:[#allocation47_spill]] }
  0x68   : > { %s3208_s3 = scalar_lea.hbm %s4502_s7, 16 }
  0x69   : > { %p3209_p13 = scmp.ne.s32.totalorder %s4502_s7, %s3208_s3  ;;  %p3215_p5 = scmp.lt.u32.totalorder %s3208_s3, %s4502_s7 }
  0x6b   : > { %p3211_p1 = pnand %p3209_p13, %p3828_p0 }
  0x6d   : > { %p3212_p6 = pneg %p3211_p1 }
  0x6f   : > { %p3217_p9 = pnand %p3215_p5, %p3212_p6 }
  0x71   : > { %3220 = shalt.err (!%p3217_p9)
}
  0x72   : > { %s3221_s1 = scalar_lea.vmem %s3818_s29, 16  ;;  %s3228_s19 = scalar_lea.vmem %s3818_s29, 32 }
  0x73   : > { %p3222_p10 = scmp.ne.s32.totalorder %s3818_s29, %s3221_s1  ;;  %p3229_p4 = scmp.lt.s32.totalorder %s3818_s29, %s3818_s29 }
  0x74   : > { %p3230_p7 = scmp.lt.s32.totalorder %s3228_s19, %s3221_s1 }
  0x75   : > { %p3224_p2 = pnand %p3222_p10, %p3828_p0 }
  0x76   : > { %p3231_p8 = por %p3230_p7, %p3229_p4 }
  0x77   : > { %p3225_p3 = pneg %p3224_p2 }
  0x79   : > { %p3232_p11 = pnand %p3231_p8, %p3225_p3 }
  0x7b   : > { %3235 = shalt.err (!%p3232_p11)
}
  0x7c   : > { %2978 = dma.hbm_to_vmem [thread:$0]  (!%p3812_p12), %s4502_s7, 16, %s3818_s29, [#allocation12]  }
  0x7d   : > { %s3611_s30 = smov [#allocation14]   ;;  %s3612_s3 = smov [#allocation17]  }
  0x7e   : > { %s641_s25 = sshll.u32 %s3611_s30, 4  ;;  %s665_s6 = sshll.u32 %s3612_s3, 4  ;;  %s642_s25 = int_to_ptr.vmem [resolvable:$true] %s641_s25  ;;  %s666_s6 = int_to_ptr.vmem [resolvable:$true] %s665_s6 }
  0x7f   : > { %s4503_s11 = sld [smem:[#allocation48_spill]] }
  0x85   : > { %s3236_s27 = scalar_lea.hbm %s4503_s11, 16 }
  0x86   : > { %p3237_p13 = scmp.ne.s32.totalorder %s4503_s11, %s3236_s27  ;;  %p3243_p5 = scmp.lt.u32.totalorder %s3236_s27, %s4503_s11 }
  0x88   : > { %p3239_p1 = pnand %p3237_p13, %p3828_p0 }
  0x8a   : > { %p3240_p6 = pneg %p3239_p1 }
  0x8c   : > { %p3245_p9 = pnand %p3243_p5, %p3240_p6 }
  0x8e   : > { %3248 = shalt.err (!%p3245_p9)
}
  0x8f   : > { %s3249_s29 = scalar_lea.vmem %s642_s25, 16  ;;  %s3256_s28 = scalar_lea.vmem %s642_s25, 32 }
  0x90   : > { %p3250_p10 = scmp.ne.s32.totalorder %s642_s25, %s3249_s29  ;;  %p3257_p4 = scmp.lt.s32.totalorder %s642_s25, %s642_s25 }
  0x91   : > { %p3258_p7 = scmp.lt.s32.totalorder %s3256_s28, %s3249_s29 }
  0x92   : > { %p3252_p2 = pnand %p3250_p10, %p3828_p0 }
  0x93   : > { %p3259_p8 = por %p3258_p7, %p3257_p4 }
  0x94   : > { %p3253_p3 = pneg %p3252_p2 }
  0x96   : > { %p3260_p11 = pnand %p3259_p8, %p3253_p3 }
  0x98   : > { %3263 = shalt.err (!%p3260_p11)
}
  0x99   : > { %2984 = dma.hbm_to_vmem [thread:$0]  (!%p3812_p12), %s4503_s11, 16, %s642_s25, [#allocation15]  }
  0x9a   : > { %s4504_s13 = sld [smem:[#allocation49_spill]] }
  0xa0   : > { %s3264_s22 = scalar_lea.hbm %s4504_s13, 16 }
  0xa1   : > { %p3265_p13 = scmp.ne.s32.totalorder %s4504_s13, %s3264_s22  ;;  %p3271_p5 = scmp.lt.u32.totalorder %s3264_s22, %s4504_s13 }
  0xa3   : > { %p3267_p1 = pnand %p3265_p13, %p3828_p0 }
  0xa5   : > { %p3268_p6 = pneg %p3267_p1 }
  0xa7   : > { %p3273_p9 = pnand %p3271_p5, %p3268_p6 }
  0xa9   : > { %3276 = shalt.err (!%p3273_p9)
}
  0xaa   : > { %s3277_s29 = scalar_lea.vmem %s666_s6, 16  ;;  %s3284_s25 = scalar_lea.vmem %s666_s6, 32 }
  0xab   : > { %p3278_p10 = scmp.ne.s32.totalorder %s666_s6, %s3277_s29  ;;  %p3285_p4 = scmp.lt.s32.totalorder %s666_s6, %s666_s6 }
  0xac   : > { %p3286_p7 = scmp.lt.s32.totalorder %s3284_s25, %s3277_s29 }
  0xad   : > { %p3280_p2 = pnand %p3278_p10, %p3828_p0 }
  0xae   : > { %p3287_p8 = por %p3286_p7, %p3285_p4 }
  0xaf   : > { %p3281_p3 = pneg %p3280_p2 }
  0xb1   : > { %p3288_p11 = pnand %p3287_p8, %p3281_p3 }
  0xb3   : > { %3291 = shalt.err (!%p3288_p11)
}
  0xb4   : > { %2990 = dma.hbm_to_vmem [thread:$0]  (!%p3812_p12), %s4504_s13, 16, %s666_s6, [#allocation18]  }
  0xb5   : > { %s3613_s3 = smov [#allocation20]   ;;  %s3614_s23 = smov [#allocation2]  }
  0xb6   : > { %s689_s2 = sshll.u32 %s3613_s3, 4  ;;  %s558_s22 = sshll.u32 %s3614_s23, 4  ;;  %s690_s2 = int_to_ptr.vmem [resolvable:$true] %s689_s2  ;;  %s559_s22 = int_to_ptr.vmem [resolvable:$true] %s558_s22 }
  0xb7   : > { %s3292_s19 = scalar_lea.hbm %s4439_s16, 256 }
  0xb8   : > { %p3293_p13 = scmp.ne.s32.totalorder %s4439_s16, %s3292_s19  ;;  %p3299_p5 = scmp.lt.u32.totalorder %s3292_s19, %s4439_s16 }
  0xba   : > { %p3295_p1 = pnand %p3293_p13, %p3828_p0 }
  0xbc   : > { %p3296_p6 = pneg %p3295_p1 }
  0xbe   : > { %p3301_p9 = pnand %p3299_p5, %p3296_p6 }
  0xc0   : > { %3304 = shalt.err (!%p3301_p9)
}
  0xc1   : > { %s3305_s6 = scalar_lea.vmem %s690_s2, 256  ;;  %p3313_p4 = scmp.lt.s32.totalorder %s690_s2, %s690_s2 }
  0xc2   : > { %p3306_p10 = scmp.ne.s32.totalorder %s690_s2, %s3305_s6  ;;  %p3314_p7 = scmp.lt.s32.totalorder %s3305_s6, %s3305_s6 }
  0xc4   : > { %p3308_p2 = pnand %p3306_p10, %p3828_p0  ;;  %p3315_p8 = por %p3314_p7, %p3313_p4 }
  0xc6   : > { %p3309_p3 = pneg %p3308_p2 }
  0xc8   : > { %p3316_p11 = pnand %p3315_p8, %p3309_p3 }
  0xca   : > { %3319 = shalt.err (!%p3316_p11)
}
  0xcb   : > { %s4465_s30 = smov 64   ;;  %s4466_s3 = smov 4  }
  0xcc   : > { %2996 = dma.hbm_to_vmem [thread:$0]  (!%p3812_p12), %s4439_s16, 256, %s690_s2, [#allocation21], %s4465_s30, %s4465_s30, %s4466_s3  }
  0xcd   : > { %s4505_s21 = sld [smem:[#allocation42_spill]] }
  0xd3   : > { %s3320_s29 = scalar_lea.hbm %s4505_s21, 16 }
  0xd4   : > { %p3321_p13 = scmp.ne.s32.totalorder %s4505_s21, %s3320_s29  ;;  %p3327_p5 = scmp.lt.u32.totalorder %s3320_s29, %s4505_s21 }
  0xd6   : > { %p3323_p1 = pnand %p3321_p13, %p3828_p0 }
  0xd8   : > { %p3324_p6 = pneg %p3323_p1 }
  0xda   : > { %p3329_p9 = pnand %p3327_p5, %p3324_p6 }
  0xdc   : > { %3332 = shalt.err (!%p3329_p9)
}
  0xdd   : > { %s3333_s23 = scalar_lea.vmem %s559_s22, 16  ;;  %s3340_s2 = scalar_lea.vmem %s559_s22, 32 }
  0xde   : > { %p3334_p10 = scmp.ne.s32.totalorder %s559_s22, %s3333_s23  ;;  %p3341_p4 = scmp.lt.s32.totalorder %s559_s22, %s559_s22 }
  0xdf   : > { %p3342_p7 = scmp.lt.s32.totalorder %s3340_s2, %s3333_s23 }
  0xe0   : > { %p3336_p2 = pnand %p3334_p10, %p3828_p0 }
  0xe1   : > { %p3343_p8 = por %p3342_p7, %p3341_p4 }
  0xe2   : > { %p3337_p3 = pneg %p3336_p2 }
  0xe4   : > { %p3344_p11 = pnand %p3343_p8, %p3337_p3 }
  0xe6   : > { %3347 = shalt.err (!%p3344_p11)
}
  0xe7   : > { %2963 = dma.hbm_to_vmem [thread:$0]  (!%p3812_p12), %s4505_s21, 16, %s559_s22, [#allocation3]  }
  0xe8   : > { %s3617_s7 = smov [#allocation7]   ;;  %s3618_s29 = smov [#allocation10]  }
  0xe9   : > { %s580_s19 = sshll.u32 %s3617_s7, 4  ;;  %s602_s25 = sshll.u32 %s3618_s29, 4  ;;  %s581_s19 = int_to_ptr.vmem [resolvable:$true] %s580_s19  ;;  %s603_s25 = int_to_ptr.vmem [resolvable:$true] %s602_s25 }
  0xea   : > { %s4506_s30 = sld [smem:[#allocation44_spill]] }
  0xf0   : > { %s4507_s3 = smov %s4506_s30  ;;  %s3348_s11 = scalar_lea.hbm %s4506_s30, 16 }
  0xf1   : > { %p3349_p13 = scmp.ne.s32.totalorder %s4507_s3, %s3348_s11  ;;  %p3355_p5 = scmp.lt.u32.totalorder %s3348_s11, %s4507_s3 }
  0xf3   : > { %p3351_p1 = pnand %p3349_p13, %p3828_p0 }
  0xf5   : > { %p3352_p6 = pneg %p3351_p1 }
  0xf7   : > { %p3357_p9 = pnand %p3355_p5, %p3352_p6 }
  0xf9   : > { %3360 = shalt.err (!%p3357_p9)
}
  0xfa   : > { %s3361_s22 = scalar_lea.vmem %s581_s19, 16  ;;  %s3368_s30 = scalar_lea.vmem %s581_s19, 32 }
  0xfb   : > { %p3362_p10 = scmp.ne.s32.totalorder %s581_s19, %s3361_s22  ;;  %p3369_p4 = scmp.lt.s32.totalorder %s581_s19, %s581_s19 }
  0xfc   : > { %p3370_p7 = scmp.lt.s32.totalorder %s3368_s30, %s3361_s22 }
  0xfd   : > { %p3364_p2 = pnand %p3362_p10, %p3828_p0 }
  0xfe   : > { %p3371_p8 = por %p3370_p7, %p3369_p4 }
  0xff   : > { %p3365_p3 = pneg %p3364_p2 }
 0x101   : > { %p3372_p11 = pnand %p3371_p8, %p3365_p3 }
 0x103   : > { %3375 = shalt.err (!%p3372_p11)
}
 0x104   : > { %2969 = dma.hbm_to_vmem [thread:$0]  (!%p3812_p12), %s4507_s3, 16, %s581_s19, [#allocation6]  }
 0x105   : > { %s4508_s29 = sld [smem:[#allocation46_spill]] }
 0x10b   : > { %s4509_s6 = smov %s4508_s29  ;;  %s3376_s28 = scalar_lea.hbm %s4508_s29, 16 }
 0x10c   : > { %p3377_p13 = scmp.ne.s32.totalorder %s4509_s6, %s3376_s28  ;;  %p3383_p5 = scmp.lt.u32.totalorder %s3376_s28, %s4509_s6 }
 0x10e   : > { %p3379_p1 = pnand %p3377_p13, %p3828_p0 }
 0x110   : > { %p3380_p6 = pneg %p3379_p1 }
 0x112   : > { %p3385_p9 = pnand %p3383_p5, %p3380_p6 }
 0x114   : > { %3388 = shalt.err (!%p3385_p9)
}
 0x115   : > { %s3389_s30 = scalar_lea.vmem %s603_s25, 16  ;;  %s3396_s19 = scalar_lea.vmem %s603_s25, 32 }
 0x116   : > { %p3390_p10 = scmp.ne.s32.totalorder %s603_s25, %s3389_s30  ;;  %p3397_p4 = scmp.lt.s32.totalorder %s603_s25, %s603_s25 }
 0x117   : > { %p3398_p7 = scmp.lt.s32.totalorder %s3396_s19, %s3389_s30 }
 0x118   : > { %p3392_p2 = pnand %p3390_p10, %p3828_p0 }
 0x119   : > { %p3399_p8 = por %p3398_p7, %p3397_p4 }
 0x11a   : > { %p3393_p3 = pneg %p3392_p2 }
 0x11c   : > { %p3400_p11 = pnand %p3399_p8, %p3393_p3 }
 0x11e   : > { %3403 = shalt.err (!%p3400_p11)
}
 0x11f   : > { %2975 = dma.hbm_to_vmem [thread:$0]  (!%p3812_p12), %s4509_s6, 16, %s603_s25, [#allocation9]  }
 0x120   : > { %s3619_s11 = smov [#allocation13]   ;;  %s3620_s29 = smov [#allocation16]  }
 0x121   : > { %s627_s13 = sshll.u32 %s3619_s11, 4  ;;  %s651_s28 = sshll.u32 %s3620_s29, 4  ;;  %s628_s13 = int_to_ptr.vmem [resolvable:$true] %s627_s13  ;;  %s652_s28 = int_to_ptr.vmem [resolvable:$true] %s651_s28 }
 0x122   : > { %s3404_s27 = scalar_lea.hbm %s4432_s9, 16 }
 0x123   : > { %p3405_p13 = scmp.ne.s32.totalorder %s4432_s9, %s3404_s27  ;;  %p3411_p5 = scmp.lt.u32.totalorder %s3404_s27, %s4432_s9 }
 0x125   : > { %p3407_p1 = pnand %p3405_p13, %p3828_p0 }
 0x127   : > { %p3408_p6 = pneg %p3407_p1 }
 0x129   : > { %p3413_p9 = pnand %p3411_p5, %p3408_p6 }
 0x12b   : > { %3416 = shalt.err (!%p3413_p9)
}
 0x12c   : > { %s3417_s25 = scalar_lea.vmem %s628_s13, 16  ;;  %s3424_s7 = scalar_lea.vmem %s628_s13, 32 }
 0x12d   : > { %p3418_p10 = scmp.ne.s32.totalorder %s628_s13, %s3417_s25  ;;  %p3425_p4 = scmp.lt.s32.totalorder %s628_s13, %s628_s13 }
 0x12e   : > { %p3426_p7 = scmp.lt.s32.totalorder %s3424_s7, %s3417_s25 }
 0x12f   : > { %p3420_p2 = pnand %p3418_p10, %p3828_p0 }
 0x130   : > { %p3427_p8 = por %p3426_p7, %p3425_p4 }
 0x131   : > { %p3421_p3 = pneg %p3420_p2 }
 0x133   : > { %p3428_p11 = pnand %p3427_p8, %p3421_p3 }
 0x135   : > { %3431 = shalt.err (!%p3428_p11)
}
 0x136   : > { %2981 = dma.hbm_to_vmem [thread:$0]  (!%p3812_p12), %s4432_s9, 16, %s628_s13, [#allocation12]  }
 0x137   : > { %s3432_s27 = scalar_lea.hbm %s4435_s12, 256 }
 0x138   : > { %p3433_p13 = scmp.ne.s32.totalorder %s4435_s12, %s3432_s27  ;;  %p3439_p5 = scmp.lt.u32.totalorder %s3432_s27, %s4435_s12 }
 0x13a   : > { %p3435_p1 = pnand %p3433_p13, %p3828_p0 }
 0x13c   : > { %p3436_p6 = pneg %p3435_p1 }
 0x13e   : > { %p3441_p9 = pnand %p3439_p5, %p3436_p6 }
 0x140   : > { %3444 = shalt.err (!%p3441_p9)
}
 0x141   : > { %s3445_s25 = scalar_lea.vmem %s652_s28, 256  ;;  %p3453_p4 = scmp.lt.s32.totalorder %s652_s28, %s652_s28 }
 0x142   : > { %p3446_p10 = scmp.ne.s32.totalorder %s652_s28, %s3445_s25  ;;  %p3454_p7 = scmp.lt.s32.totalorder %s3445_s25, %s3445_s25 }
 0x144   : > { %p3448_p2 = pnand %p3446_p10, %p3828_p0  ;;  %p3455_p8 = por %p3454_p7, %p3453_p4 }
 0x146   : > { %p3449_p3 = pneg %p3448_p2 }
 0x148   : > { %p3456_p11 = pnand %p3455_p8, %p3449_p3 }
 0x14a   : > { %3459 = shalt.err (!%p3456_p11)
}
 0x14b   : > { %s4510_s13 = smov 4   ;;  %s4511_s7 = smov 64  }
 0x14c   : > { %2987 = dma.hbm_to_vmem [thread:$0]  (!%p3812_p12), %s4435_s12, 256, %s652_s28, [#allocation15], %s4511_s7, %s4511_s7, %s4510_s13  }
 0x14d   : > { %s3621_s23 = smov [#allocation19]   ;;  %s3622_s27 = smov [#allocation22]  }
 0x14e   : > { %s679_s2 = sshll.u32 %s3621_s23, 4  ;;  %s703_s22 = sshll.u32 %s3622_s27, 4  ;;  %s680_s2 = int_to_ptr.vmem [resolvable:$true] %s679_s2  ;;  %s704_s22 = int_to_ptr.vmem [resolvable:$true] %s703_s22 }
 0x14f   : > { %s3460_s1 = scalar_lea.hbm %s4438_s15, 16 }
 0x150   : > { %p3461_p13 = scmp.ne.s32.totalorder %s4438_s15, %s3460_s1  ;;  %p3467_p5 = scmp.lt.u32.totalorder %s3460_s1, %s4438_s15 }
 0x152   : > { %p3463_p1 = pnand %p3461_p13, %p3828_p0 }
 0x154   : > { %p3464_p6 = pneg %p3463_p1 }
 0x156   : > { %p3469_p9 = pnand %p3467_p5, %p3464_p6 }
 0x158   : > { %3472 = shalt.err (!%p3469_p9)
}
 0x159   : > { %s3473_s28 = scalar_lea.vmem %s680_s2, 16  ;;  %s3480_s13 = scalar_lea.vmem %s680_s2, 32 }
 0x15a   : > { %p3474_p10 = scmp.ne.s32.totalorder %s680_s2, %s3473_s28  ;;  %p3481_p4 = scmp.lt.s32.totalorder %s680_s2, %s680_s2 }
 0x15b   : > { %p3482_p7 = scmp.lt.s32.totalorder %s3480_s13, %s3473_s28 }
 0x15c   : > { %p3476_p2 = pnand %p3474_p10, %p3828_p0 }
 0x15d   : > { %p3483_p8 = por %p3482_p7, %p3481_p4 }
 0x15e   : > { %p3477_p3 = pneg %p3476_p2 }
 0x160   : > { %p3484_p11 = pnand %p3483_p8, %p3477_p3 }
 0x162   : > { %3487 = shalt.err (!%p3484_p11)
}
 0x163   : > { %2993 = dma.hbm_to_vmem [thread:$0]  (!%p3812_p12), %s4438_s15, 16, %s680_s2, [#allocation18]  }
 0x164   : > { %s3488_s23 = scalar_lea.hbm %s4440_s17, 16 }
 0x165   : > { %p3489_p13 = scmp.ne.s32.totalorder %s4440_s17, %s3488_s23  ;;  %p3495_p5 = scmp.lt.u32.totalorder %s3488_s23, %s4440_s17 }
 0x167   : > { %p3491_p1 = pnand %p3489_p13, %p3828_p0 }
 0x169   : > { %p3492_p6 = pneg %p3491_p1 }
 0x16b   : > { %p3497_p9 = pnand %p3495_p5, %p3492_p6 }
 0x16d   : > { %3500 = shalt.err (!%p3497_p9)
}
 0x16e   : > { %s3501_s25 = scalar_lea.vmem %s704_s22, 16  ;;  %s3508_s2 = scalar_lea.vmem %s704_s22, 32 }
 0x16f   : > { %p3502_p10 = scmp.ne.s32.totalorder %s704_s22, %s3501_s25  ;;  %p3509_p4 = scmp.lt.s32.totalorder %s704_s22, %s704_s22 }
 0x170   : > { %p3510_p7 = scmp.lt.s32.totalorder %s3508_s2, %s3501_s25 }
 0x171   : > { %p3504_p2 = pnand %p3502_p10, %p3828_p0 }
 0x172   : > { %p3511_p8 = por %p3510_p7, %p3509_p4 }
 0x173   : > { %p3505_p3 = pneg %p3504_p2 }
 0x175   : > { %p3512_p11 = pnand %p3511_p8, %p3505_p3 }
 0x177   : > { %3515 = shalt.err (!%p3512_p11)
}
 0x178   : > { %2999 = dma.hbm_to_vmem [thread:$0]  (!%p3812_p12), %s4440_s17, 16, %s704_s22, [#allocation21]  }
 0x179   : > { %p4512_p13 = scmp.ne.s32.totalorder %s4497_s26, 0 }
 0x17a   : > { %p4513_p1 = scmp.eq.s32.totalorder (!%p4512_p13), %s3776_s4, 0 }
 0x17b   : > { %742 = sbr.rel (%p4512_p13) target bundleno = 4787 (0x12b3), region = 108 }
 0x182   : > { %3561 = dma.done.wait (%p4513_p1), [#allocation3], 16   ;;  %p4514_p0 = pmov %p4513_p1 }
 0x184   : > { %3563 = vsyncadd (%p4514_p0), [#allocation3], 4294967280  ;;  %p4515_p6 = pmov %p4514_p0 }
 0x185   : > { %p4516_p5 = pmov %p4514_p0 }
 0x186   : > { %3565 = dma.done.wait (%p4515_p6), [#allocation6], 32  }
 0x187   : > { %3567 = vsyncadd (%p4516_p5), [#allocation6], 4294967264  ;;  %p4517_p9 = pmov %p4514_p0 }
 0x188   : > { %p4518_p12 = pmov %p4514_p0 }
 0x189   : > { %3569 = dma.done.wait (%p4517_p9), [#allocation9], 32  }
 0x18a   : > { %3571 = vsyncadd (%p4518_p12), [#allocation9], 4294967264  ;;  %p4519_p10 = pmov %p4514_p0 }
 0x18b   : > { %p4520_p2 = pmov %p4514_p0 }
 0x18c   : > { %3573 = dma.done.wait (%p4519_p10), [#allocation12], 32  }
 0x18d   : > { %3575 = vsyncadd (%p4520_p2), [#allocation12], 4294967264  ;;  %p4521_p3 = pmov %p4514_p0 }
 0x18e   : > { %p4522_p4 = pmov %p4514_p0 }
 0x18f   : > { %3577 = dma.done.wait (%p4521_p3), [#allocation15], 272  }
 0x190   : > { %3579 = vsyncadd (%p4522_p4), [#allocation15], 4294967024  ;;  %p4523_p7 = pmov %p4514_p0 }
 0x191   : > { %p4524_p8 = pmov %p4514_p0 }
 0x192   : > { %3581 = dma.done.wait (%p4523_p7), [#allocation18], 32  }
 0x193   : > { %3583 = vsyncadd (%p4524_p8), [#allocation18], 4294967264  ;;  %p4525_p11 = pmov %p4514_p0 }
 0x194   : > { %p4526_p13 = pmov %p4514_p0 }
 0x195   : > { %3585 = dma.done.wait (%p4525_p11), [#allocation21], 272  }
 0x196   : > { %3587 = vsyncadd (%p4526_p13), [#allocation21], 4294967024  ;;  %p855_p1 = scmp.lt.s32.totalorder %s3776_s4, 1  ;;  %s4527_s13 = sld [smem:[#allocation40_spill]]  ;;  %vm868_vm0 = vcmask 261120   ;;  %v3094_v7 = vld [vmem:[%s4431_s8] sm:$0xff]   ;;  %v965_v38 = vlaneseq }
 0x197   : > { %v3623_v8 = vmov 0.0   ;;  %vm3624_vm1 = vmmov 0   ;;  %v3095_v9 = vld [vmem:[%s4431_s8 + $0x8] sm:$0xff]   ;;  %v2639_v14 = vld [vmem:[#allocation2] ss:$0 sm:$0xff]  ;;  %s3625_s27 = smov 120  }
 0x198   : > { %s4110_s26 = scalar_select %p855_p1, %s3776_s4, 1  ;;  %2750 = vmatprep.subr.bf16.mxu1 %v3623_v8  ;;  %2754 = vmatprep.mubr.msk.bf16.mxu1 %vm3624_vm1, %v3623_v8  ;;  %v2640_v16 = vld [vmem:[#allocation5] ss:$0 sm:$0xff]  ;;  %v2641_v20 = vld [vmem:[#allocation13] ss:$0 sm:$0xff]  ;;  %vm973_vm2 = vcmask 64512  }
 0x199   : > { %2751 = vmatpush3.bf16.msra.mxu1 %v3094_v7  ;;  %2764 = vmatprep.subr.bf16.mxu0 %v3623_v8  ;;  %s3626_s30 = smov 96   ;;  %s3627_s19 = smov 88   ;;  %v966_v39 = vshrl.u32 %v965_v38, 7  ;;  %v968_v40 = vand.u32 127, %v965_v38  ;;  %vm1038_vm4 = vcmask 1043456   ;;  %vm1428_vm5 = vcmask 130048  }
 0x19a   : > { %s2637_s5 = sshll.u32 %s4110_s26, 3  ;;  %2752 = vmatprep.subr.bf16.mxu1 %v3623_v8  ;;  %2766 = vmatprep.mubr.msk.bf16.mxu0 %vm3624_vm1, %v3623_v8  ;;  %s3628_s1 = smov 80   ;;  %vm1430_vm6 = vcmask 195584   ;;  %vm2349_vm8 = vcmask 523264  }
 0x19b   : > { %s3629_s25 = smov 112   ;;  %s3630_s2 = smov 72   ;;  %vm969_vm3 = vcmp.le.s32.totalorder %v968_v40, %v966_v39 }
 0x19c   : > { %s858_s3 = scalar_lea.vmem %s4527_s13, %s2637_s5  ;;  %s3631_s11 = smov 104  }
 0x19d   : > { %v4118_v0 = vld [vmem:[%s858_s3] sm:$0xff]  ;;  %2753 = vmatpush3.bf16.msra.mxu1 %v3095_v9  ;;  %s3632_s28 = smov 64   ;;  %s3633_s0 = smov 56  }
 0x19e   : > { %v869_v1 = vsel %vm868_vm0, %v4118_v0, 0.0  ;;  %2758 = vmatprep.subr.bf16.mxu1 %v3623_v8  ;;  %s3634_s22 = smov 48   ;;  %s3635_s13 = smov 40  }
 0x19f   : > { %870 = vadd.xlane.f32.xlu0 %v869_v1  ;;  %s3636_s3 = smov 8   ;;  %s4528_s7 = sld [smem:[#allocation41_spill]] }
 0x1a0   : > { %s4529_s26 = smov 16   ;;  %s4531_s29 = sld [smem:[#allocation50_spill]] }
 0x1a1   : > { %s4532_s23 = sld [smem:[#allocation33_spill]] }
 0x1a5   : > { %s862_s6 = scalar_lea.vmem %s4528_s7, %s2637_s5  ;;  %s4530_s5 = smov 24  }
 0x1a6   : > { %s3639_s7 = smov [#allocation23]  }
 0x22c   : > { %v871_v2 = vpop.xlane.xlu0 %870 }
 0x22d   : > { %v873_v3 = vmul.f32 0.03125, %v871_v2 }
 0x22f   : > { %v874_v4 = vsub.f32 %v4118_v0, %v873_v3 }
 0x231   : > { %v875_v5 = vmul.f32 %v874_v4, %v874_v4 }
 0x233   : > { %v876_v6 = vsel %vm868_vm0, %v875_v5, 0.0 }
 0x234   : > { %877 = vadd.xlane.f32.xlu0 %v876_v6 }
 0x2c1   : > { %v878_v10 = vpop.xlane.xlu0 %877 }
 0x2c2   : > { %v879_v11 = vmul.f32 0.03125, %v878_v10 }
 0x2c4   : > { %v880_v12 = vadd.f32 1e-05, %v879_v11 }
 0x2c6   : > { %3110 = vrsqrt.f32 %v880_v12 }
 0x2d0   : > { %v3111_v13 = vpop.eup %3110 }
 0x2d1   : > { %v882_v15 = vmul.f32 %v3111_v13, %v874_v4 }
 0x2d3   : > { %v889_v17 = vmul.f32 %v2639_v14, %v882_v15 }
 0x2d5   : > { %v896_v18 = vadd.f32 %v2640_v16, %v889_v17 }
 0x2d7   : > { %v902_v19 = vpack.c.bf16 %v896_v18, %v896_v18 }
 0x2d9   : > { %2755 = vmatmul.mubr.msk.bf16.vlgmr.msra.gmra.mrb[0].mxu1 %vm868_vm0, %v902_v19 }
 0x2da   : > { %2760 = vmatprep.mubr.msk.bf16.mxu1 %vm3624_vm1, %v3623_v8 }
 0x3ac   : > { %v958_v21 = vpop.f32.mrb[0].mxu1 }
 0x3ad   : > { %v959_v22 = vadd.f32 %v2641_v20, %v958_v21  ;;  %v2756_v23 = vpop.f32.mrb[1].mxu1 }
 0x3ae   : > { %v961_v24 = vpop.f32.mrb[2].mxu1 }
 0x3af   : > { %v4141_v25 = vpack.c.bf16 %v959_v22, %v959_v22  ;;  %v2757_v26 = vpop.f32.mrb[3].mxu1 }
 0x3b1   : > { %1082 = vrot.lane.b32.xlu0 %v4141_v25, %s3625_s27  ;;  %971 = vrot.lane.b32.xlu1 %v4141_v25, %s3626_s30 }
 0x3b5   : > { %1084 = vrot.lane.b32.xlu1 %v4141_v25, %s3627_s19 }
 0x3b9   : > { %1195 = vrot.lane.b32.xlu1 %v4141_v25, %s3628_s1 }
 0x3bd   : > { %1193 = vrot.lane.b32.xlu1 %v4141_v25, %s3629_s25 }
 0x3c1   : > { %1306 = vrot.lane.b32.xlu1 %v4141_v25, %s3630_s2 }
 0x3c5   : > { %1304 = vrot.lane.b32.xlu1 %v4141_v25, %s3631_s11 }
 0x423   : > { %v972_v27 = vpop.permute.xlu1 %971  ;;  %v1083_v32 = vpop.permute.xlu0 %1082 }
 0x424   : > { %v978_v28 = vsel %vm973_vm2, %v972_v27, 0 }
 0x425   : > { %2759 = vmatpush3.bf16.xpose.msra.mxu1 %v978_v28 }
 0x426   : > { %2770 = vmatprep.subr.bf16.mxu1 %v3623_v8 }
 0x427   : > { %v1085_v29 = vpop.permute.xlu1 %1084 }
 0x428   : > { %v1090_v30 = vsel %vm973_vm2, %v1085_v29, 0 }
 0x42b   : > { %v1196_v31 = vpop.permute.xlu1 %1195 }
 0x42c   : > { %2761 = vmatmul.mubr.msk.bf16.vlgmr.msra.gmra.mrb[4].mxu1 %vm973_vm2, %v4141_v25  ;;  %v1201_v34 = vsel %vm973_vm2, %v1196_v31, 0 }
 0x42d   : > { %2771 = vmatpush3.bf16.xpose.msra.mxu1 %v1090_v30  ;;  %2772 = vmatprep.mubr.msk.bf16.mxu1 %vm3624_vm1, %v3623_v8 }
 0x42e   : > { %2782 = vmatprep.subr.bf16.mxu1 %v3623_v8 }
 0x42f   : > { %v1194_v33 = vpop.permute.xlu1 %1193 }
 0x433   : > { %v1307_v35 = vpop.permute.xlu1 %1306 }
 0x434   : > { %2773 = vmatmul.mubr.msk.bf16.vlgmr.msra.gmra.mrb[8].mxu1 %vm973_vm2, %v1083_v32  ;;  %v1312_v36 = vsel %vm973_vm2, %v1307_v35, 0 }
 0x435   : > { %2783 = vmatpush3.bf16.xpose.msra.mxu1 %v1201_v34  ;;  %2784 = vmatprep.mubr.msk.bf16.mxu1 %vm3624_vm1, %v3623_v8 }
 0x436   : > { %2794 = vmatprep.subr.bf16.mxu1 %v3623_v8 }
 0x437   : > { %v1305_v37 = vpop.permute.xlu1 %1304 }
 0x43c   : > { %2785 = vmatmul.mubr.msk.bf16.vlgmr.msra.gmra.mrb[12].mxu1 %vm973_vm2, %v1194_v33 }
 0x43d   : > { %2795 = vmatpush3.bf16.xpose.msra.mxu1 %v1312_v36  ;;  %2796 = vmatprep.mubr.msk.bf16.mxu1 %vm3624_vm1, %v3623_v8 }
 0x43e   : > { %2806 = vmatprep.subr.bf16.mxu1 %v3623_v8 }
 0x444   : > { %2797 = vmatmul.mubr.msk.bf16.vlgmr.msra.gmra.mrb[16].mxu1 %vm973_vm2, %v1305_v37 }
 0x445   : > { %2810 = vmatprep.mubr.msk.bf16.mxu1 %vm3624_vm1, %v3623_v8 }
 0x4ff   : > { %v1014_v41 = vpop.f32.mrb[4].mxu1 }
 0x500   : > { %v1020_v42 = vsel %vm969_vm3, -inf, %v1014_v41  ;;  %v2762_v43 = vpop.f32.mrb[5].mxu1 }
 0x501   : > { %v1017_v44 = vpop.f32.mrb[6].mxu1  ;;  %v1021_v45 = vsel %vm973_vm2, %v1020_v42, -inf }
 0x502   : > { %1022 = vmax.xlane.f32.xlu1 %v1021_v45  ;;  %v2763_v46 = vpop.f32.mrb[7].mxu1 }
 0x507   : > { %v1126_v47 = vpop.f32.mrb[8].mxu1 }
 0x508   : > { %v1132_v48 = vsel %vm969_vm3, -inf, %v1126_v47  ;;  %v2774_v49 = vpop.f32.mrb[9].mxu1 }
 0x509   : > { %v1129_v50 = vpop.f32.mrb[10].mxu1  ;;  %v1133_v51 = vsel %vm973_vm2, %v1132_v48, -inf }
 0x50a   : > { %1134 = vmax.xlane.f32.xlu0 %v1133_v51  ;;  %v2775_v52 = vpop.f32.mrb[11].mxu1 }
 0x50f   : > { %v1237_v53 = vpop.f32.mrb[12].mxu1 }
 0x510   : > { %v1243_v54 = vsel %vm969_vm3, -inf, %v1237_v53  ;;  %v2786_v55 = vpop.f32.mrb[13].mxu1 }
 0x511   : > { %v1240_v56 = vpop.f32.mrb[14].mxu1  ;;  %v1244_v57 = vsel %vm973_vm2, %v1243_v54, -inf  ;;  %v3096_v55 = vld [vmem:[%s4433_s10] sm:$0xff]  }
 0x512   : > { %1245 = vmax.xlane.f32.xlu1 %v1244_v57  ;;  %v2787_v58 = vpop.f32.mrb[15].mxu1  ;;  %2807 = vmatpush3.bf16.msra.mxu1 %v3096_v55  ;;  %v3097_v56 = vld [vmem:[%s4433_s10 + $0x8] sm:$0xff]  }
 0x513   : > { %2808 = vmatprep.subr.bf16.mxu1 %v3623_v8 }
 0x516   : > { %2809 = vmatpush3.bf16.msra.mxu1 %v3097_v56 }
 0x517   : > { %v1348_v59 = vpop.f32.mrb[16].mxu1  ;;  %2822 = vmatprep.subr.bf16.mxu1 %v3623_v8 }
 0x518   : > { %v1354_v60 = vsel %vm969_vm3, -inf, %v1348_v59  ;;  %v2798_v61 = vpop.f32.mrb[17].mxu1 }
 0x519   : > { %v1351_v62 = vpop.f32.mrb[18].mxu1  ;;  %v1355_v63 = vsel %vm973_vm2, %v1354_v60, -inf }
 0x51a   : > { %1356 = vmax.xlane.f32.xlu0 %v1355_v63  ;;  %v2799_v1 = vpop.f32.mrb[19].mxu1 }
 0x58f   : > { %v1023_v2 = vpop.xlane.xlu1 %1022 }
 0x590   : > { %v1024_v3 = vsub.f32 %v1020_v42, %v1023_v2 }
 0x592   : > { %v1025_v4 = vmul.f32 1.442695, %v1024_v3 }
 0x594   : > { %3112 = vpow2.f32 %v1025_v4 }
 0x597   : > { %v1135_v5 = vpop.xlane.xlu0 %1134 }
 0x598   : > { %v1136_v6 = vsub.f32 %v1132_v48, %v1135_v5 }
 0x59a   : > { %v1137_v7 = vmul.f32 1.442695, %v1136_v6 }
 0x59c   : > { %3114 = vpow2.f32 %v1137_v7 }
 0x59e   : > { %v3113_v9 = vpop.eup %3112 }
 0x59f   : > { %v1027_v10 = vsel %vm973_vm2, %v3113_v9, 0.0  ;;  %v1246_v18 = vpop.xlane.xlu1 %1245 }
 0x5a0   : > { %1028 = vadd.xlane.f32.xlu1 %v1027_v10  ;;  %v1247_v19 = vsub.f32 %v1243_v54, %v1246_v18  ;;  %v2653_v10 = vld [vmem:[#allocation14] ss:$0 sm:$0xff] }
 0x5a2   : > { %v1248_v20 = vmul.f32 1.442695, %v1247_v19 }
 0x5a6   : > { %v3115_v11 = vpop.eup %3114 }
 0x5a7   : > { %v1357_v12 = vpop.xlane.xlu0 %1356  ;;  %v1139_v13 = vsel %vm973_vm2, %v3115_v11, 0.0 }
 0x5a8   : > { %v1358_v14 = vsub.f32 %v1354_v60, %v1357_v12  ;;  %1140 = vadd.xlane.f32.xlu0 %v1139_v13 }
 0x5aa   : > { %v1359_v15 = vmul.f32 1.442695, %v1358_v14 }
 0x5ac   : > { %3116 = vpow2.f32 %v1359_v15 }
 0x5ad   : > { %3118 = vpow2.f32 %v1248_v20 }
 0x5b1   : > { %1033 = vrot.lane.b32.xlu1 %v4141_v25, %s3632_s28  ;;  %s4470_s28 = smov 16  }
 0x5b6   : > { %v3117_v16 = vpop.eup %3116 }
 0x5b7   : > { %v1361_v17 = vsel %vm973_vm2, %v3117_v16, 0.0  ;;  %v3119_v21 = vpop.eup %3118 }
 0x5b8   : > { %1362 = vadd.xlane.f32.xlu0 %v1361_v17  ;;  %v1250_v22 = vsel %vm973_vm2, %v3119_v21, 0.0 }
 0x5ce   : > { %1145 = vrot.lane.b32.xlu0 %v4141_v25, %s3633_s0  ;;  %s4469_s0 = smov 24  }
 0x5d5   : > { %1251 = vadd.xlane.f32.xlu1 %v1250_v22 }
 0x5e6   : > { %1256 = vrot.lane.b32.xlu1 %v4141_v25, %s3634_s22 }
 0x5ea   : > { %1367 = vrot.lane.b32.xlu1 %v4141_v25, %s3635_s13 }
 0x62d   : > { %v1029_v23 = vpop.xlane.xlu1 %1028 }
 0x62e   : > { %3120 = vrcp.f32 %v1029_v23  ;;  %v865_v23 = vld [vmem:[%s862_s6] sm:$0xff]  ;;  %s3520_s6 = sshll.u32 %s3639_s7, 4  ;;  %s3521_s6 = int_to_ptr.vmem [resolvable:$false] %s3520_s6 }
 0x631   : > { %v1034_v24 = vpop.permute.xlu1 %1033 }
 0x632   : > { %v1040_v26 = vsel %vm1038_vm4, %v1034_v24, 0  ;;  %v3099_v24 = vld [vmem:[%s4437_s14 + $0x8] sm:$0xff]  }
 0x633   : > { %2765 = vmatpush3.bf16.msra.mxu0 %v1040_v26  ;;  %v1601_v26 = vpack.c.bf16 %v865_v23, %v865_v23 }
 0x634   : > { %2776 = vmatprep.subr.bf16.mxu0 %v3623_v8 }
 0x635   : > { %v1141_v28 = vpop.xlane.xlu0 %1140 }
 0x636   : > { %3122 = vrcp.f32 %v1141_v28  ;;  %v3101_v28 = vld [vmem:[#allocation16 + $0x8] sm:$0xff]  }
 0x638   : > { %v3121_v27 = vpop.eup %3120 }
 0x639   : > { %v1031_v29 = vmul.f32 %v3121_v27, %v3113_v9  ;;  %v3100_v27 = vld [vmem:[#allocation16] sm:$0xff]  }
 0x63b   : > { %v1032_v30 = vpack.c.bf16 %v1031_v29, %v1031_v29 }
 0x63d   : > { %2767 = vmatmul.mubr.msk.bf16.vlgmr.msra.gmra.mrb[0].mxu0 %vm973_vm2, %v1032_v30 }
 0x63e   : > { %2778 = vmatprep.mubr.msk.bf16.mxu0 %vm3624_vm1, %v3623_v8 }
 0x640   : > { %v3123_v25 = vpop.eup %3122 }
 0x641   : > { %v1143_v32 = vmul.f32 %v3123_v25, %v3115_v11 }
 0x643   : > { %v1144_v35 = vpack.c.bf16 %v1143_v32, %v1143_v32  ;;  %v2657_v32 = vld [vmem:[#allocation7] ss:$0 sm:$0xff] }
 0x645   : > { %v1363_v31 = vpop.xlane.xlu0 %1362 }
 0x649   : > { %v1146_v33 = vpop.permute.xlu0 %1145 }
 0x64a   : > { %v1151_v34 = vsel %vm1038_vm4, %v1146_v33, 0 }
 0x64b   : > { %2777 = vmatpush3.bf16.msra.mxu0 %v1151_v34  ;;  %v2658_v34 = vld [vmem:[#allocation8] ss:$0 sm:$0xff] }
 0x64c   : > { %2788 = vmatprep.subr.bf16.mxu0 %v3623_v8 }
 0x64e   : > { %2779 = vmatmul.mubr.msk.bf16.vlgmr.msra.gmra.mrb[4].mxu0 %vm973_vm2, %v1144_v35 }
 0x64f   : > { %2790 = vmatprep.mubr.msk.bf16.mxu0 %vm3624_vm1, %v3623_v8 }
 0x662   : > { %v1252_v36 = vpop.xlane.xlu1 %1251 }
 0x663   : > { %3124 = vrcp.f32 %v1252_v36 }
 0x664   : > { %3126 = vrcp.f32 %v1363_v31 }
 0x666   : > { %v1257_v37 = vpop.permute.xlu1 %1256 }
 0x667   : > { %v1262_v38 = vsel %vm1038_vm4, %v1257_v37, 0 }
 0x668   : > { %2789 = vmatpush3.bf16.msra.mxu0 %v1262_v38  ;;  %v2663_v38 = vld [vmem:[#allocation19] ss:$0 sm:$0xff] }
 0x669   : > { %2800 = vmatprep.subr.bf16.mxu0 %v3623_v8 }
 0x66a   : > { %v1368_v41 = vpop.permute.xlu1 %1367 }
 0x66b   : > { %v1373_v44 = vsel %vm1038_vm4, %v1368_v41, 0 }
 0x66d   : > { %v3125_v39 = vpop.eup %3124 }
 0x66e   : > { %v1254_v40 = vmul.f32 %v3125_v39, %v3119_v21  ;;  %v3127_v43 = vpop.eup %3126 }
 0x66f   : > { %v1365_v45 = vmul.f32 %v3127_v43, %v3117_v16 }
 0x670   : > { %v1255_v42 = vpack.c.bf16 %v1254_v40, %v1254_v40 }
 0x671   : > { %v1366_v46 = vpack.c.bf16 %v1365_v45, %v1365_v45 }
 0x672   : > { %2791 = vmatmul.mubr.msk.bf16.vlgmr.msra.gmra.mrb[8].mxu0 %vm973_vm2, %v1255_v42 }
 0x673   : > { %2801 = vmatpush3.bf16.msra.mxu0 %v1373_v44  ;;  %2802 = vmatprep.mubr.msk.bf16.mxu0 %vm3624_vm1, %v3623_v8 }
 0x674   : > { %2814 = vmatprep.subr.bf16.mxu0 %v3623_v8 }
 0x67a   : > { %2803 = vmatmul.mubr.msk.bf16.vlgmr.msra.gmra.mrb[12].mxu0 %vm973_vm2, %v1366_v46  ;;  %v2659_v46 = vld [vmem:[#allocation17] ss:$0 sm:$0xff] }
 0x67b   : > { %2818 = vmatprep.mubr.msk.bf16.mxu0 %vm3624_vm1, %v3623_v8  ;;  %2815 = vmatpush3.bf16.msra.mxu0 %v3100_v27 }
 0x67c   : > { %2816 = vmatprep.subr.bf16.mxu0 %v3623_v8 }
 0x67f   : > { %2817 = vmatpush3.bf16.msra.mxu0 %v3101_v28 }
 0x680   : > { %2830 = vmatprep.subr.bf16.mxu0 %v3623_v8 }
 0x710   : > { %v1076_v47 = vpop.f32.mrb[0].mxu0 }
 0x711   : > { %v2768_v48 = vpop.f32.mrb[1].mxu0 }
 0x712   : > { %v1079_v49 = vpop.f32.mrb[2].mxu0 }
 0x713   : > { %v2769_v50 = vpop.f32.mrb[3].mxu0 }
 0x721   : > { %v1187_v51 = vpop.f32.mrb[4].mxu0 }
 0x722   : > { %1416 = vrot.lane.b32.xlu0 %v1187_v51, %s3636_s3  ;;  %v2780_v52 = vpop.f32.mrb[5].mxu0 }
 0x723   : > { %v1190_v53 = vpop.f32.mrb[6].mxu0 }
 0x724   : > { %v2781_v54 = vpop.f32.mrb[7].mxu0 }
 0x745   : > { %v1298_v57 = vpop.f32.mrb[8].mxu0 }
 0x746   : > { %1420 = vrot.lane.b32.xlu1 %v1298_v57, %s4470_s28  ;;  %v2792_v58 = vpop.f32.mrb[9].mxu0 }
 0x747   : > { %v1301_v59 = vpop.f32.mrb[10].mxu0 }
 0x748   : > { %v2793_v60 = vpop.f32.mrb[11].mxu0 }
 0x74d   : > { %v1409_v61 = vpop.f32.mrb[12].mxu0 }
 0x74e   : > { %1424 = vrot.lane.b32.xlu0 %v1409_v61, %s4469_s0  ;;  %v2804_v62 = vpop.f32.mrb[13].mxu0  ;;  %s4535_s0 = sld [smem:[#allocation52_spill]] }
 0x74f   : > { %v1412_v63 = vpop.f32.mrb[14].mxu0 }
 0x750   : > { %v2805_v1 = vpop.f32.mrb[15].mxu0 }
 0x794   : > { %v1417_v2 = vpop.permute.xlu0 %1416 }
 0x795   : > { %v1427_v4 = vsel %vm973_vm2, %v1076_v47, %v1417_v2 }
 0x7b8   : > { %v1421_v3 = vpop.permute.xlu1 %1420 }
 0x7b9   : > { %v1429_v5 = vsel %vm1428_vm5, %v1427_v4, %v1421_v3 }
 0x7c0   : > { %v1425_v6 = vpop.permute.xlu0 %1424 }
 0x7c1   : > { %v1431_v7 = vsel %vm1430_vm6, %v1429_v5, %v1425_v6 }
 0x7c2   : > { %v1437_v9 = vpack.c.bf16 %v1431_v7, %v1431_v7 }
 0x7c4   : > { %2811 = vmatmul.mubr.msk.bf16.vlgmr.msra.gmra.mrb[20].mxu1 %vm868_vm0, %v1437_v9 }
 0x7c5   : > { %2826 = vmatprep.mubr.msk.bf16.mxu1 %vm3624_vm1, %v3623_v8 }
 0x897   : > { %v1493_v11 = vpop.f32.mrb[20].mxu1 }
 0x898   : > { %v1494_v12 = vadd.f32 %v2653_v10, %v1493_v11  ;;  %v2812_v13 = vpop.f32.mrb[21].mxu1 }
 0x899   : > { %v1496_v14 = vpop.f32.mrb[22].mxu1 }
 0x89a   : > { %v4232_v15 = vadd.f32 %v1494_v12, %v4118_v0  ;;  %v2813_v16 = vpop.f32.mrb[23].mxu1  ;;  %v3098_v0 = vld [vmem:[%s4437_s14] sm:$0xff]  }
 0x89b   : > { %2823 = vmatpush3.bf16.msra.mxu1 %v3098_v0 }
 0x89c   : > { %v1502_v17 = vsel %vm868_vm0, %v4232_v15, 0.0  ;;  %2824 = vmatprep.subr.bf16.mxu1 %v3623_v8 }
 0x89d   : > { %1503 = vadd.xlane.f32.xlu1 %v1502_v17 }
 0x89f   : > { %2825 = vmatpush3.bf16.msra.mxu1 %v3099_v24 }
 0x8a0   : > { %2836 = vmatprep.subr.bf16.mxu1 %v3623_v8 }
 0x8a2   : > { %2827 = vmatmul.mubr.msk.bf16.vlgmr.msra.gmra.mrb[24].mxu1 %vm868_vm0, %v1601_v26 }
 0x8a3   : > { %2838 = vmatprep.mubr.msk.bf16.mxu1 %vm3624_vm1, %v3623_v8 }
 0x92a   : > { %v1504_v18 = vpop.xlane.xlu1 %1503 }
 0x92b   : > { %v1505_v19 = vmul.f32 0.03125, %v1504_v18 }
 0x92d   : > { %v1506_v20 = vsub.f32 %v4232_v15, %v1505_v19 }
 0x92f   : > { %v1507_v21 = vmul.f32 %v1506_v20, %v1506_v20 }
 0x931   : > { %v1508_v22 = vsel %vm868_vm0, %v1507_v21, 0.0 }
 0x932   : > { %1509 = vadd.xlane.f32.xlu0 %v1508_v22 }
 0x975   : > { %v1657_v39 = vpop.f32.mrb[24].mxu1 }
 0x976   : > { %v1658_v40 = vadd.f32 %v2663_v38, %v1657_v39  ;;  %v2828_v41 = vpop.f32.mrb[25].mxu1 }
 0x977   : > { %v1660_v42 = vpop.f32.mrb[26].mxu1 }
 0x978   : > { %v4259_v43 = vpack.c.bf16 %v1658_v40, %v1658_v40  ;;  %v2829_v44 = vpop.f32.mrb[27].mxu1 }
 0x97a   : > { %1775 = vrot.lane.b32.xlu0 %v4259_v43, %s3625_s27  ;;  %v1669_v45 = vsel %vm973_vm2, %v4259_v43, 0 }
 0x9bf   : > { %v1510_v29 = vpop.xlane.xlu0 %1509 }
 0x9c0   : > { %v1511_v30 = vmul.f32 0.03125, %v1510_v29 }
 0x9c2   : > { %v1512_v25 = vadd.f32 1e-05, %v1511_v30 }
 0x9c4   : > { %3128 = vrsqrt.f32 %v1512_v25 }
 0x9ce   : > { %v3129_v31 = vpop.eup %3128 }
 0x9cf   : > { %v1514_v33 = vmul.f32 %v3129_v31, %v1506_v20 }
 0x9d1   : > { %v1521_v35 = vmul.f32 %v2657_v32, %v1514_v33 }
 0x9d3   : > { %v1528_v36 = vadd.f32 %v2658_v34, %v1521_v35 }
 0x9d5   : > { %v1534_v37 = vpack.c.bf16 %v1528_v36, %v1528_v36 }
 0x9d7   : > { %2819 = vmatmul.mubr.msk.bf16.vlgmr.msra.gmra.mrb[16].mxu0 %vm868_vm0, %v1534_v37 }
 0x9d8   : > { %2832 = vmatprep.mubr.msk.bf16.mxu0 %vm3624_vm1, %v3623_v8  ;;  %2831 = vmatpush3.bf16.xpose.msra.mxu0 %v1669_v45 }
 0x9d9   : > { %2842 = vmatprep.subr.bf16.mxu0 %v3623_v8 }
 0x9ec   : > { %v1776_v50 = vpop.permute.xlu0 %1775 }
 0x9ed   : > { %v1781_v54 = vsel %vm973_vm2, %v1776_v50, 0 }
 0xaaa   : > { %v1590_v47 = vpop.f32.mrb[16].mxu0 }
 0xaab   : > { %v1591_v48 = vadd.f32 %v2659_v46, %v1590_v47  ;;  %v2820_v49 = vpop.f32.mrb[17].mxu0 }
 0xaac   : > { %v1593_v51 = vpop.f32.mrb[18].mxu0 }
 0xaad   : > { %v1663_v52 = vpack.c.bf16 %v1591_v48, %v1591_v48  ;;  %v2821_v53 = vpop.f32.mrb[19].mxu0 }
 0xaaf   : > { %1773 = vrot.lane.b32.xlu1 %v1663_v52, %s3625_s27  ;;  %1883 = vrot.lane.b32.xlu0 %v1663_v52, %s3629_s25 }
 0xab0   : > { %2833 = vmatmul.mubr.msk.bf16.vlgmr.msra.gmra.mrb[20].mxu0 %vm973_vm2, %v1663_v52 }
 0xab1   : > { %2843 = vmatpush3.bf16.xpose.msra.mxu0 %v1781_v54  ;;  %2844 = vmatprep.mubr.msk.bf16.mxu0 %vm3624_vm1, %v3623_v8 }
 0xab2   : > { %2854 = vmatprep.subr.bf16.mxu0 %v3623_v8 }
 0xab3   : > { %1885 = vrot.lane.b32.xlu1 %v4259_v43, %s3629_s25  ;;  %1993 = vrot.lane.b32.xlu0 %v1663_v52, %s3631_s11  ;;  %s2692_s25 = sshll.u32 %s3776_s4, 7 }
 0xab4   : > { %s4380_s22 = scalar_lea.hbm %s4535_s0, %s2692_s25 }
 0xab7   : > { %1995 = vrot.lane.b32.xlu1 %v4259_v43, %s3631_s11 }
 0xb21   : > { %v1774_v55 = vpop.permute.xlu1 %1773  ;;  %v1884_v59 = vpop.permute.xlu0 %1883 }
 0xb22   : > { %2845 = vmatmul.mubr.msk.bf16.vlgmr.msra.gmra.mrb[24].mxu0 %vm973_vm2, %v1774_v55 }
 0xb23   : > { %2856 = vmatprep.mubr.msk.bf16.mxu0 %vm3624_vm1, %v3623_v8 }
 0xb25   : > { %v1886_v56 = vpop.permute.xlu1 %1885  ;;  %v1994_v61 = vpop.permute.xlu0 %1993 }
 0xb26   : > { %v1891_v57 = vsel %vm973_vm2, %v1886_v56, 0 }
 0xb27   : > { %2855 = vmatpush3.bf16.xpose.msra.mxu0 %v1891_v57 }
 0xb28   : > { %2866 = vmatprep.subr.bf16.mxu0 %v3623_v8 }
 0xb29   : > { %v1996_v58 = vpop.permute.xlu1 %1995 }
 0xb2a   : > { %v2001_v60 = vsel %vm973_vm2, %v1996_v58, 0 }
 0xb2e   : > { %2857 = vmatmul.mubr.msk.bf16.vlgmr.msra.gmra.mrb[28].mxu0 %vm973_vm2, %v1884_v59 }
 0xb2f   : > { %2867 = vmatpush3.bf16.xpose.msra.mxu0 %v2001_v60  ;;  %2868 = vmatprep.mubr.msk.bf16.mxu0 %vm3624_vm1, %v3623_v8 }
 0xb30   : > { %2878 = vmatprep.subr.bf16.mxu0 %v3623_v8 }
 0xb36   : > { %2869 = vmatmul.mubr.msk.bf16.vlgmr.msra.gmra.mrb[32].mxu0 %vm973_vm2, %v1994_v61 }
 0xb37   : > { %2882 = vmatprep.mubr.msk.bf16.mxu0 %vm3624_vm1, %v3623_v8 }
 0xb83   : > { %v1705_v62 = vpop.f32.mrb[20].mxu0 }
 0xb84   : > { %v2834_v63 = vpop.f32.mrb[21].mxu0  ;;  %v1711_v1 = vsel %vm973_vm2, %v1705_v62, -inf }
 0xb85   : > { %1712 = vmax.xlane.f32.xlu1 %v1711_v1  ;;  %v1708_v2 = vpop.f32.mrb[22].mxu0 }
 0xb86   : > { %v2835_v3 = vpop.f32.mrb[23].mxu0 }
 0xbf5   : > { %v1817_v4 = vpop.f32.mrb[24].mxu0 }
 0xbf6   : > { %v2846_v5 = vpop.f32.mrb[25].mxu0  ;;  %v1823_v6 = vsel %vm973_vm2, %v1817_v4, -inf }
 0xbf7   : > { %1824 = vmax.xlane.f32.xlu0 %v1823_v6  ;;  %v1820_v7 = vpop.f32.mrb[26].mxu0 }
 0xbf8   : > { %v2847_v9 = vpop.f32.mrb[27].mxu0 }
 0xc01   : > { %v1927_v10 = vpop.f32.mrb[28].mxu0 }
 0xc02   : > { %v2858_v11 = vpop.f32.mrb[29].mxu0  ;;  %v1933_v12 = vsel %vm973_vm2, %v1927_v10, -inf }
 0xc03   : > { %1934 = vmax.xlane.f32.xlu0 %v1933_v12  ;;  %v1930_v13 = vpop.f32.mrb[30].mxu0  ;;  %v3103_v11 = vld [vmem:[#allocation20 + $0x8] sm:$0xff]  }
 0xc04   : > { %v2859_v14 = vpop.f32.mrb[31].mxu0 }
 0xc09   : > { %v2037_v16 = vpop.f32.mrb[32].mxu0 }
 0xc0a   : > { %v2870_v17 = vpop.f32.mrb[33].mxu0  ;;  %v2043_v18 = vsel %vm973_vm2, %v2037_v16, -inf }
 0xc0b   : > { %2044 = vmax.xlane.f32.xlu1 %v2043_v18  ;;  %v2040_v19 = vpop.f32.mrb[34].mxu0 }
 0xc0c   : > { %v2871_v20 = vpop.f32.mrb[35].mxu0 }
 0xc12   : > { %v1713_v21 = vpop.xlane.xlu1 %1712 }
 0xc13   : > { %v1714_v22 = vsub.f32 %v1705_v62, %v1713_v21 }
 0xc15   : > { %v1715_v0 = vmul.f32 1.442695, %v1714_v22 }
 0xc17   : > { %3130 = vpow2.f32 %v1715_v0 }
 0xc21   : > { %v3131_v23 = vpop.eup %3130 }
 0xc22   : > { %v1717_v24 = vsel %vm973_vm2, %v3131_v23, 0.0 }
 0xc23   : > { %1718 = vadd.xlane.f32.xlu0 %v1717_v24 }
 0xc84   : > { %v1825_v26 = vpop.xlane.xlu0 %1824 }
 0xc85   : > { %v1826_v27 = vsub.f32 %v1817_v4, %v1825_v26 }
 0xc87   : > { %v1827_v28 = vmul.f32 1.442695, %v1826_v27 }
 0xc89   : > { %3132 = vpow2.f32 %v1827_v28  ;;  %v2675_v28 = vld [vmem:[#allocation22] ss:$0 sm:$0xff] }
 0xc90   : > { %v1935_v29 = vpop.xlane.xlu0 %1934 }
 0xc91   : > { %v1936_v30 = vsub.f32 %v1927_v10, %v1935_v29  ;;  %v3102_v10 = vld [vmem:[#allocation20] sm:$0xff]  }
 0xc92   : > { %2879 = vmatpush3.bf16.msra.mxu0 %v3102_v10 }
 0xc93   : > { %v3133_v25 = vpop.eup %3132  ;;  %v1937_v31 = vmul.f32 1.442695, %v1936_v30  ;;  %2880 = vmatprep.subr.bf16.mxu0 %v3623_v8 }
 0xc94   : > { %v1829_v32 = vsel %vm973_vm2, %v3133_v25, 0.0 }
 0xc95   : > { %3134 = vpow2.f32 %v1937_v31  ;;  %1830 = vadd.xlane.f32.xlu1 %v1829_v32 }
 0xc96   : > { %2881 = vmatpush3.bf16.msra.mxu0 %v3103_v11 }
 0xc97   : > { %2894 = vmatprep.subr.bf16.mxu0 %v3623_v8 }
 0xc98   : > { %v2045_v35 = vpop.xlane.xlu1 %2044 }
 0xc99   : > { %v2046_v36 = vsub.f32 %v2037_v16, %v2045_v35 }
 0xc9b   : > { %v2047_v37 = vmul.f32 1.442695, %v2046_v36 }
 0xc9d   : > { %3136 = vpow2.f32 %v2047_v37 }
 0xc9f   : > { %v3135_v33 = vpop.eup %3134 }
 0xca0   : > { %v1939_v34 = vsel %vm973_vm2, %v3135_v33, 0.0 }
 0xca1   : > { %1940 = vadd.xlane.f32.xlu0 %v1939_v34 }
 0xca6   : > { %1835 = vrot.lane.b32.xlu1 %v4259_v43, %s3627_s19  ;;  %s4533_s19 = sld [smem:[#allocation51_spill]] }
 0xca7   : > { %v3137_v38 = vpop.eup %3136 }
 0xca8   : > { %v2049_v39 = vsel %vm973_vm2, %v3137_v38, 0.0 }
 0xcb0   : > { %v1719_v40 = vpop.xlane.xlu0 %1718 }
 0xcb1   : > { %3138 = vrcp.f32 %v1719_v40  ;;  %v3104_v40 = vld [vmem:[%s4441_s18] sm:$0xff]  }
 0xcb7   : > { %1724 = vrot.lane.b32.xlu0 %v4259_v43, %s3626_s30 }
 0xcbb   : > { %2055 = vrot.lane.b32.xlu0 %v4259_v43, %s3630_s2  ;;  %v3139_v42 = vpop.eup %3138 }
 0xcbc   : > { %v1721_v45 = vmul.f32 %v3139_v42, %v3131_v23 }
 0xcbe   : > { %v1722_v49 = vpack.c.bf16 %v1721_v45, %v1721_v45 }
 0xcca   : > { %2050 = vadd.xlane.f32.xlu1 %v2049_v39 }
 0xcdb   : > { %1945 = vrot.lane.b32.xlu1 %v4259_v43, %s3628_s1  ;;  %s4534_s1 = sld [smem:[#allocation38_spill]] }
 0xce1   : > { %p4536_p6 = scmp.ne.s32.totalorder %s4534_s1, 0 }
 0xd22   : > { %v1831_v41 = vpop.xlane.xlu1 %1830 }
 0xd23   : > { %3140 = vrcp.f32 %v1831_v41 }
 0xd26   : > { %v1836_v48 = vpop.permute.xlu1 %1835 }
 0xd27   : > { %v1841_v51 = vsel %vm1038_vm4, %v1836_v48, 0  ;;  %v2680_v48 = vld [vmem:[#allocation11] ss:$0 sm:$0xff] }
 0xd2d   : > { %v3141_v50 = vpop.eup %3140 }
 0xd2e   : > { %v1941_v44 = vpop.xlane.xlu0 %1940  ;;  %v1833_v43 = vmul.f32 %v3141_v50, %v3133_v25 }
 0xd2f   : > { %3142 = vrcp.f32 %v1941_v44 }
 0xd30   : > { %v1834_v52 = vpack.c.bf16 %v1833_v43, %v1833_v43  ;;  %v3106_v43 = vld [vmem:[%s4443_s20] sm:$0xff]  }
 0xd32   : > { %v1725_v46 = vpop.permute.xlu0 %1724 }
 0xd33   : > { %v1730_v47 = vsel %vm1038_vm4, %v1725_v46, 0  ;;  %v2679_v46 = vld [vmem:[#allocation10] ss:$0 sm:$0xff] }
 0xd34   : > { %2837 = vmatpush3.bf16.msra.mxu1 %v1730_v47 }
 0xd35   : > { %2848 = vmatprep.subr.bf16.mxu1 %v3623_v8 }
 0xd36   : > { %v2056_v58 = vpop.permute.xlu0 %2055 }
 0xd37   : > { %2839 = vmatmul.mubr.msk.bf16.vlgmr.msra.gmra.mrb[28].mxu1 %vm973_vm2, %v1722_v49  ;;  %v2061_v60 = vsel %vm1038_vm4, %v2056_v58, 0 }
 0xd38   : > { %2849 = vmatpush3.bf16.msra.mxu1 %v1841_v51  ;;  %2850 = vmatprep.mubr.msk.bf16.mxu1 %vm3624_vm1, %v3623_v8 }
 0xd39   : > { %2860 = vmatprep.subr.bf16.mxu1 %v3623_v8  ;;  %v3143_v53 = vpop.eup %3142 }
 0xd3a   : > { %v1943_v55 = vmul.f32 %v3143_v53, %v3135_v33  ;;  %v3108_v53 = vld [vmem:[%s4443_s20 + $0x10] sm:$0xff]  }
 0xd3c   : > { %v1944_v59 = vpack.c.bf16 %v1943_v55, %v1943_v55  ;;  %v2681_v55 = vld [vmem:[%s4531_s29] ss:$0 sm:$0xff]  ;;  %s3522_s29 = scalar_lea.vmem %s3521_s6, 256 }
 0xd3f   : > { %2851 = vmatmul.mubr.msk.bf16.vlgmr.msra.gmra.mrb[32].mxu1 %vm973_vm2, %v1834_v52  ;;  %v3107_v52 = vld [vmem:[%s4443_s20 + $0x8] sm:$0xff]  }
 0xd40   : > { %2862 = vmatprep.mubr.msk.bf16.mxu1 %vm3624_vm1, %v3623_v8 }
 0xd57   : > { %v2051_v54 = vpop.xlane.xlu1 %2050 }
 0xd58   : > { %3144 = vrcp.f32 %v2051_v54  ;;  %v3109_v54 = vld [vmem:[%s4443_s20 + $0x18] sm:$0xff]  }
 0xd5b   : > { %v1946_v56 = vpop.permute.xlu1 %1945 }
 0xd5c   : > { %v1951_v57 = vsel %vm1038_vm4, %v1946_v56, 0 }
 0xd5d   : > { %2861 = vmatpush3.bf16.msra.mxu1 %v1951_v57 }
 0xd5e   : > { %2872 = vmatprep.subr.bf16.mxu1 %v3623_v8 }
 0xd60   : > { %2863 = vmatmul.mubr.msk.bf16.vlgmr.msra.gmra.mrb[36].mxu1 %vm973_vm2, %v1944_v59 }
 0xd61   : > { %2873 = vmatpush3.bf16.msra.mxu1 %v2061_v60  ;;  %2874 = vmatprep.mubr.msk.bf16.mxu1 %vm3624_vm1, %v3623_v8 }
 0xd62   : > { %v3145_v61 = vpop.eup %3144  ;;  %2886 = vmatprep.subr.bf16.mxu1 %v3623_v8 }
 0xd63   : > { %v2053_v62 = vmul.f32 %v3145_v61, %v3137_v38 }
 0xd65   : > { %v2054_v63 = vpack.c.bf16 %v2053_v62, %v2053_v62 }
 0xd68   : > { %2875 = vmatmul.mubr.msk.bf16.vlgmr.msra.gmra.mrb[40].mxu1 %vm973_vm2, %v2054_v63 }
 0xd69   : > { %2890 = vmatprep.mubr.msk.bf16.mxu1 %vm3624_vm1, %v3623_v8  ;;  %2887 = vmatpush3.bf16.msra.mxu1 %v3104_v40 }
 0xd6a   : > { %2888 = vmatprep.subr.bf16.mxu1 %v3623_v8 }
 0xe0a   : > { %v1766_v1 = vpop.f32.mrb[28].mxu1 }
 0xe0b   : > { %v2840_v2 = vpop.f32.mrb[29].mxu1 }
 0xe0c   : > { %v1769_v3 = vpop.f32.mrb[30].mxu1 }
 0xe0d   : > { %v2841_v4 = vpop.f32.mrb[31].mxu1 }
 0xe12   : > { %v1877_v5 = vpop.f32.mrb[32].mxu1 }
 0xe13   : > { %2104 = vrot.lane.b32.xlu1 %v1877_v5, %s3636_s3  ;;  %v2852_v6 = vpop.f32.mrb[33].mxu1 }
 0xe14   : > { %v1880_v7 = vpop.f32.mrb[34].mxu1 }
 0xe15   : > { %v2853_v9 = vpop.f32.mrb[35].mxu1 }
 0xe33   : > { %v1987_v12 = vpop.f32.mrb[36].mxu1 }
 0xe34   : > { %2108 = vrot.lane.b32.xlu0 %v1987_v12, %s4529_s26  ;;  %v2864_v13 = vpop.f32.mrb[37].mxu1  ;;  %s852_s26 = sand.u32 1, %s4532_s23  }
 0xe35   : > { %v1990_v14 = vpop.f32.mrb[38].mxu1  ;;  %s2396_s4 = scalar_lea.sflag [#allocation4], %s852_s26 }
 0xe36   : > { %v2865_v16 = vpop.f32.mrb[39].mxu1 }
 0xe3b   : > { %v2097_v17 = vpop.f32.mrb[40].mxu1 }
 0xe3c   : > { %2112 = vrot.lane.b32.xlu1 %v2097_v17, %s4530_s5  ;;  %v2876_v18 = vpop.f32.mrb[41].mxu1  ;;  %s2636_s5 = sshll.u32 %s852_s26, 3 }
 0xe3d   : > { %v2100_v19 = vpop.f32.mrb[42].mxu1  ;;  %s854_s2 = scalar_lea.vmem [#allocation23], %s2636_s5 }
 0xe3e   : > { %v2877_v20 = vpop.f32.mrb[43].mxu1  ;;  %s2409_s11 = sshll.u32 %s854_s2, 4  ;;  %s4382_s11 = int_to_ptr.vmem [resolvable:$true] %s2409_s11 }
 0xe3f   : > { %s3516_s13 = scalar_lea.vmem %s4382_s11, 128  ;;  %p3523_p12 = scmp.lt.s32.totalorder %s4382_s11, %s3521_s6 }
 0xe40   : > { %p3517_p0 = scmp.ne.s32.totalorder %s4382_s11, %s3516_s13  ;;  %p3524_p10 = scmp.lt.s32.totalorder %s3522_s29, %s3516_s13 }
 0xe42   : > { %p3518_p5 = pnand %p3517_p0, %p4536_p6  ;;  %p3525_p2 = por %p3524_p10, %p3523_p12 }
 0xe44   : > { %p3519_p9 = pneg %p3518_p5 }
 0xe46   : > { %p3526_p3 = pnand %p3525_p2, %p3519_p9 }
 0xe85   : > { %v2105_v21 = vpop.permute.xlu1 %2104 }
 0xe86   : > { %v2115_v0 = vsel %vm973_vm2, %v1766_v1, %v2105_v21 }
 0xea6   : > { %v2109_v22 = vpop.permute.xlu0 %2108 }
 0xea7   : > { %v2116_v23 = vsel %vm1428_vm5, %v2115_v0, %v2109_v22 }
 0xeae   : > { %v2113_v24 = vpop.permute.xlu1 %2112 }
 0xeaf   : > { %v2117_v26 = vsel %vm1430_vm6, %v2116_v23, %v2113_v24  ;;  %v2685_v24 = vld [vmem:[%s4533_s19] ss:$0 sm:$0xff] }
 0xeb0   : > { %v2123_v27 = vpack.c.bf16 %v2117_v26, %v2117_v26 }
 0xeb2   : > { %2883 = vmatmul.mubr.msk.bf16.vlgmr.msra.gmra.mrb[36].mxu0 %vm868_vm0, %v2123_v27 }
 0xeb3   : > { %2902 = vmatprep.mubr.msk.bf16.mxu0 %vm3624_vm1, %v3623_v8  ;;  %2895 = vmatpush3.bf16.msra.mxu0 %v3106_v43 }
 0xeb4   : > { %2896 = vmatprep.subr.bf16.mxu0 %v3623_v8 }
 0xeb7   : > { %2897 = vmatpush3.bf16.msra.mxu0 %v3107_v52 }
 0xeb8   : > { %2898 = vmatprep.subr.bf16.mxu0 %v3623_v8 }
 0xebb   : > { %2899 = vmatpush3.bf16.msra.mxu0 %v3108_v53 }
 0xebc   : > { %2900 = vmatprep.subr.bf16.mxu0 %v3623_v8 }
 0xebf   : > { %2901 = vmatpush3.bf16.msra.mxu0 %v3109_v54 }
 0xf85   : > { %v2179_v29 = vpop.f32.mrb[36].mxu0 }
 0xf86   : > { %v2180_v30 = vadd.f32 %v2675_v28, %v2179_v29  ;;  %v2884_v25 = vpop.f32.mrb[37].mxu0 }
 0xf87   : > { %v2182_v31 = vpop.f32.mrb[38].mxu0 }
 0xf88   : > { %v4339_v32 = vadd.f32 %v2180_v30, %v4232_v15  ;;  %v2885_v33 = vpop.f32.mrb[39].mxu0  ;;  %v3105_v15 = vld [vmem:[%s4441_s18 + $0x8] sm:$0xff]  }
 0xf89   : > { %2889 = vmatpush3.bf16.msra.mxu1 %v3105_v15 }
 0xf8a   : > { %v2188_v34 = vsel %vm868_vm0, %v4339_v32, 0.0 }
 0xf8b   : > { %2189 = vadd.xlane.f32.xlu0 %v2188_v34 }
0x1018   : > { %v2190_v35 = vpop.xlane.xlu0 %2189 }
0x1019   : > { %v2191_v36 = vmul.f32 0.03125, %v2190_v35 }
0x101b   : > { %v2192_v37 = vsub.f32 %v4339_v32, %v2191_v36 }
0x101d   : > { %v2193_v38 = vmul.f32 %v2192_v37, %v2192_v37 }
0x101f   : > { %v2194_v39 = vsel %vm868_vm0, %v2193_v38, 0.0 }
0x1020   : > { %2195 = vadd.xlane.f32.xlu1 %v2194_v39 }
0x10ad   : > { %v2196_v41 = vpop.xlane.xlu1 %2195 }
0x10ae   : > { %v2197_v42 = vmul.f32 0.03125, %v2196_v41 }
0x10b0   : > { %v2198_v44 = vadd.f32 1e-05, %v2197_v42 }
0x10b2   : > { %3146 = vrsqrt.f32 %v2198_v44 }
0x10bc   : > { %v3147_v45 = vpop.eup %3146 }
0x10bd   : > { %v2200_v47 = vmul.f32 %v3147_v45, %v2192_v37 }
0x10bf   : > { %v2207_v49 = vmul.f32 %v2679_v46, %v2200_v47 }
0x10c1   : > { %v2214_v50 = vadd.f32 %v2680_v48, %v2207_v49 }
0x10c3   : > { %v2220_v51 = vpack.c.bf16 %v2214_v50, %v2214_v50 }
0x10c5   : > { %2891 = vmatmul.mubr.msk.bf16.vlgmr.msra.gmra.mrb[44].mxu1 %vm868_vm0, %v2220_v51 }
0x1198   : > { %v2276_v56 = vpop.f32.mrb[44].mxu1 }
0x1199   : > { %v2277_v57 = vadd.f32 %v2681_v55, %v2276_v56  ;;  %v2892_v58 = vpop.f32.mrb[45].mxu1 }
0x119a   : > { %v2279_v59 = vpop.f32.mrb[46].mxu1 }
0x119b   : > { %v2283_v60 = vmul.f32 0.70710677, %v2277_v57  ;;  %v2893_v61 = vpop.f32.mrb[47].mxu1  ;;  %v2282_v21 = vmul.f32 0.5, %v2277_v57 }
0x119d   : > { %v2284_v62 = vand.u32 2147483647, %v2283_v60  ;;  %vm2304_vm7 = vcmp.lt.f32.partialorder %v2283_v60, 0.0 }
0x119f   : > { %v2285_v63 = vmul.f32 0.3275911, %v2284_v62  ;;  %v2298_v8 = vsub.f32 0.0, %v2284_v62 }
0x11a1   : > { %v2286_v1 = vadd.f32 1.0, %v2285_v63  ;;  %v2299_v3 = vmul.f32 %v2298_v8, %v2284_v62 }
0x11a3   : > { %3148 = vrcp.f32 %v2286_v1  ;;  %v2300_v6 = vmul.f32 1.442695, %v2299_v3 }
0x11a5   : > { %3150 = vpow2.f32 %v2300_v6 }
0x11ad   : > { %v3149_v2 = vpop.eup %3148 }
0x11ae   : > { %v2289_v4 = vmul.f32 1.0614054, %v3149_v2 }
0x11af   : > { %v3151_v16 = vpop.eup %3150 }
0x11b0   : > { %v2290_v5 = vadd.f32 -1.4531521, %v2289_v4 }
0x11b2   : > { %v2291_v7 = vmul.f32 %v3149_v2, %v2290_v5 }
0x11b4   : > { %v2292_v9 = vadd.f32 1.4214138, %v2291_v7 }
0x11b6   : > { %v2293_v10 = vmul.f32 %v3149_v2, %v2292_v9 }
0x11b8   : > { %v2294_v11 = vadd.f32 -0.28449672, %v2293_v10 }
0x11ba   : > { %v2295_v12 = vmul.f32 %v3149_v2, %v2294_v11 }
0x11bc   : > { %v2296_v13 = vadd.f32 0.2548296, %v2295_v12 }
0x11be   : > { %v2297_v14 = vmul.f32 %v3149_v2, %v2296_v13 }
0x11c0   : > { %v2302_v17 = vmul.f32 %v3151_v16, %v2297_v14 }
0x11c2   : > { %v2303_v18 = vsub.f32 1.0, %v2302_v17 }
0x11c4   : > { %v2305_v19 = vsub.f32 0.0, %v2303_v18 }
0x11c6   : > { %v2306_v20 = vsel %vm2304_vm7, %v2305_v19, %v2303_v18 }
0x11c7   : > { %v2307_v22 = vadd.f32 1.0, %v2306_v20 }
0x11c9   : > { %v2308_v0 = vmul.f32 %v2307_v22, %v2282_v21 }
0x11cb   : > { %v2318_v23 = vpack.c.bf16 %v2308_v0, %v2308_v0 }
0x11cd   : > { %2903 = vmatmul.mubr.msk.bf16.vlgmr.msra.gmra.mrb[40].mxu0 %vm2349_vm8, %v2318_v23 }
0x12a0   : > { %v2387_v26 = vpop.f32.mrb[40].mxu0 }
0x12a1   : > { %v2388_v27 = vadd.f32 %v2685_v24, %v2387_v26  ;;  %v2904_v28 = vpop.f32.mrb[41].mxu0 }
0x12a2   : > { %v2390_v29 = vpop.f32.mrb[42].mxu0 }
0x12a3   : > { %v2393_v30 = vadd.f32 %v2388_v27, %v4339_v32  ;;  %v2905_v25 = vpop.f32.mrb[43].mxu0 }
0x12a5   : > { %2394 = vst.msk [vmem:[%s854_s2] sm:$0xff] %vm868_vm0, %v2393_v30 }
0x12a6   : > { %3529 = shalt.err (!%p3526_p3)
}
0x12a7   : > { %s3530_s23 = scalar_lea.hbm %s4380_s22, 128  ;;  %s3534_s27 = scalar_lea.hbm %s4535_s0, 256 }
0x12a8   : > { %p3531_p4 = scmp.ne.s32.totalorder %s4380_s22, %s3530_s23  ;;  %p3535_p11 = scmp.lt.u32.totalorder %s4380_s22, %s4535_s0 }
0x12a9   : > { %p3536_p13 = scmp.lt.u32.totalorder %s3534_s27, %s3530_s23  ;;  %p3538_p0 = scmp.lt.u32.totalorder %s3530_s23, %s4380_s22 }
0x12aa   : > { %p3532_p7 = pnand %p3531_p4, %p4536_p6 }
0x12ab   : > { %p3537_p1 = por %p3536_p13, %p3535_p11 }
0x12ac   : > { %p3533_p8 = pneg %p3532_p7 }
0x12ad   : > { %p3539_p5 = por %p3538_p0, %p3537_p1 }
0x12af   : > { %p3540_p9 = pnand %p3539_p5, %p3533_p8 }
0x12b1   : > { %3543 = shalt.err (!%p3540_p9)
}
0x12b2   : > { %2958 = dma.vmem_to_hbm [thread:$0]  (%p4536_p6), %s4382_s11, 128, %s4380_s22, %s2396_s4  }
0x12b3 PF: > { %s4537_s25 = sld [smem:[#allocation35_spill]]  ;;  %s4538_s2 = sld [smem:[#allocation32_spill]] }
0x12b4   : > { %s4539_s3 = sld [smem:[#allocation39_spill]] }
0x12b9   : > { %p3030_p12 = scmp.ge.s32.totalorder %s4537_s25, 2  ;;  %s2421_s28 = sand.u32 1, %s4538_s2  }
0x12ba   : > { %p4540_p10 = scmp.ne.s32.totalorder %s4539_s3, 0  ;;  %s2422_s13 = scalar_lea.sflag [#allocation4], %s2421_s28 }
0x12bc   : > { %p3001_p2 = pnand %p3030_p12, %p4540_p10 }
0x12be   : > { %3589 = dma.done.wait (!%p3001_p2), %s2422_s13, 128  }
0x12bf   : > { %3591 = vsyncadd (!%p3001_p2), %s2422_s13, 4294967168  ;;  %s4541_s30 = sld [smem:[#allocation36_spill]]  ;;  %s4542_s3 = sld [smem:[#allocation33_spill]] }
0x12c0   : > { %s4543_s28 = sld [smem:[#allocation34_spill]]  ;;  %s4544_s29 = sld [smem:[#allocation37_spill]] }
0x12c5   : > { %p39_p3 = scmp.ge.s32.totalorder %s4541_s30, 4   ;;  %4545 = sst [smem:[#allocation32_spill]] %s4542_s3 }
0x12c7   :  { %41 = sbr.rel (!%p39_p3) target bundleno = 25 (0x19), region = 199 }
0x12ce   :  { %2427 = vsyncpa [#allocation3], 1 }
0x12cf   :  { %2429 = vsyncpa [#allocation3 + $0x1], 1 }
0x12d0   :  { %2430 = vsyncpa [#allocation6], 1 }
0x12d1   :  { %2431 = vsyncpa [#allocation9], 1 }
0x12d2   :  { %2432 = vsyncpa [#allocation12], 1 }
0x12d3   :  { %2433 = vsyncpa [#allocation15], 1 }
0x12d4   :  { %2434 = vsyncpa [#allocation18], 1 }
0x12d5   :  { %2435 = vsyncpa [#allocation21], 1 }
0x12d6   :  { %2436 = vsyncpa [#allocation4], 1 }
0x12d7   :  { %2438 = vsyncpa [#allocation4 + $0x1], 1 }

</bundles_post_ra>
